<compile_context>
chip_gen: v6e
topology: v6e:2x2x1
jax: 0.10.0
libtpu: 0.0.40
codegen_flags: <defaults>
</compile_context>

<pallas_src>
import functools

import jax
import jax.numpy as jnp
from jax.experimental import pallas as pl
from jax.experimental.pallas import tpu as pltpu


def _double_conv_kernel(xm_ref, xh_ref, w1_ref, s1_ref, b1_ref,
                        w2_ref, s2_ref, b2_ref, o_ref, h1_ref, *, h_img):
    """Fused [conv3x3 -> BN -> ReLU] x 2 for one (batch, row-tile) grid step.

    xm_ref : (1, TH,  W+2, Cin)  row block of the spatially padded input
    xh_ref : (1, 4,   W+2, Cin)  next 4 padded rows (halo for the 3x3 stencils)
    w1_ref : (9*Cin, C1)         conv1 taps flattened (tap-major, channel-minor)
    s1_ref, b1_ref : (1, C1)     folded BN1 scale / bias (includes conv bias)
    w2_ref : (9*C1, C2)          conv2 taps flattened
    s2_ref, b2_ref : (1, C2)     folded BN2 scale / bias
    o_ref  : (1, TH, W, C2)      output row block
    h1_ref : (TH+2, W+2, C1) f32 VMEM scratch for the intermediate activation
    """
    th = xm_ref.shape[1]
    wp = xm_ref.shape[2]
    w = wp - 2
    cin = xm_ref.shape[3]
    c1 = w1_ref.shape[1]
    c2 = w2_ref.shape[1]
    cdt = w1_ref.dtype
    j = pl.program_id(1)

    # (TH+4, W+2, Cin) halo'd input window, assembled in VMEM from the two
    # auto-pipelined row blocks.
    xwin = jnp.concatenate([xm_ref[0], xh_ref[0]], axis=0)

    # --- conv1 as ONE (M1, 9*Cin) x (9*Cin, C1) matmul, M1 = (TH+2)*W rows ---
    # (taps are concatenated as 32-bit vregs for robustness with packed dtypes,
    #  then cast back to the compute dtype for the MXU).
    m1 = (th + 2) * w
    taps1 = [xwin[dy:dy + th + 2, dx:dx + w, :].astype(jnp.float32)
             for dy in range(3) for dx in range(3)]
    patches1 = jnp.concatenate(taps1, axis=-1).reshape(m1, 9 * cin)
    acc1 = jnp.dot(patches1.astype(cdt), w1_ref[...],
                   preferred_element_type=jnp.float32)
    y1 = jnp.maximum(acc1 * s1_ref[...] + b1_ref[...], 0.0)
    y1 = y1.reshape(th + 2, w, c1)

    # Rows of the conv1 output that fall outside the real image must be exactly
    # zero (they are conv2's zero padding), not relu(folded-BN bias).
    row = jax.lax.broadcasted_iota(jnp.int32, (th + 2, w, c1), 0) + (j * th - 1)
    y1 = jnp.where((row >= 0) & (row < h_img), y1, 0.0)

    # Stage the intermediate activation in VMEM with one zero column on each
    # side (conv2's SAME padding in W). It never round-trips through HBM.
    h1_ref[...] = jnp.zeros_like(h1_ref)
    h1_ref[:, 1:w + 1, :] = y1

    # --- conv2 as ONE (M2, 9*C1) x (9*C1, C2) matmul, M2 = TH*W rows ---
    m2 = th * w
    taps2 = [h1_ref[dy:dy + th, dx:dx + w, :]
             for dy in range(3) for dx in range(3)]
    patches2 = jnp.concatenate(taps2, axis=-1).reshape(m2, 9 * c1)
    acc2 = jnp.dot(patches2.astype(cdt), w2_ref[...],
                   preferred_element_type=jnp.float32)
    y2 = jnp.maximum(acc2 * s2_ref[...] + b2_ref[...], 0.0)
    o_ref[0] = y2.reshape(th, w, c2).astype(o_ref.dtype)


def _choose_row_tile(h, w, cin, c1, c2, act_bytes, max_rows=None,
                     vmem_budget=10 * 1024 * 1024):
    """Largest multiple-of-8 row tile whose working set fits the VMEM budget.

    The budget stays well under the scoped-VMEM default (16-32 MiB) so
    double-buffering survives on v7x's 64 MiB physical VMEM; pass a smaller
    `vmem_budget` / `max_rows` to shrink tiles further.
    """
    cap = -(-h // 8) * 8                      # no point tiling beyond the image
    if max_rows is not None:
        cap = min(cap, max(8, (max_rows // 8) * 8))
    best = 8
    for th in range(8, cap + 1, 8):
        need = (
            (th + 4) * (w + 2) * cin * act_bytes * 2     # input blocks (x2 buf)
            + th * w * c2 * act_bytes * 2                # output block (x2 buf)
            + (th + 2) * (w + 2) * c1 * 4                # f32 intermediate scratch
            + (9 * cin * c1 + 9 * c1 * c2 + 2 * (c1 + c2)) * 4 * 2  # weights/affine
            + (th + 2) * w * (9 * cin + 2 * c1) * 4      # conv1 patches + acc
            + th * w * (9 * c1 + 2 * c2) * 4             # conv2 patches + acc
        )
        if need <= vmem_budget:
            best = th
        else:
            break
    return best


def double_conv_pallas(x_nhwc, w1, s1, b1, w2, s2, b2, *,
                       compute_dtype=None, max_row_tile=None):
    """Fused (conv3x3 + folded BN + ReLU) x 2 on an NHWC input, one pallas_call."""
    n, h, w, cin = x_nhwc.shape
    c1 = w1.shape[-1]
    c2 = w2.shape[-1]
    cdt = jnp.dtype(compute_dtype) if compute_dtype is not None else x_nhwc.dtype
    act_bytes = jnp.dtype(cdt).itemsize

    th = _choose_row_tile(h, w, cin, c1, c2, act_bytes, max_rows=max_row_tile)
    h_pad = -(-h // th) * th                  # round H up to a tile multiple
    n_row_tiles = h_pad // th

    # SAME padding: 2 rows top, 2 (+ H round-up) rows bottom, 1 column per side.
    xp = jnp.pad(x_nhwc, ((0, 0), (2, 2 + h_pad - h), (1, 1), (0, 0))).astype(cdt)
    w1m = w1.reshape(9 * cin, c1).astype(cdt)     # tap-major, channel-minor
    w2m = w2.reshape(9 * c1, c2).astype(cdt)
    s1v = s1.reshape(1, c1).astype(jnp.float32)
    b1v = b1.reshape(1, c1).astype(jnp.float32)
    s2v = s2.reshape(1, c2).astype(jnp.float32)
    b2v = b2.reshape(1, c2).astype(jnp.float32)

    kernel = functools.partial(_double_conv_kernel, h_img=h)
    out = pl.pallas_call(
        kernel,
        out_shape=jax.ShapeDtypeStruct((n, h_pad, w, c2), x_nhwc.dtype),
        grid_spec=pltpu.PrefetchScalarGridSpec(
            num_scalar_prefetch=0,
            grid=(n, n_row_tiles),
            in_specs=[
                # TH padded-input rows for this tile ...
                pl.BlockSpec((1, th, w + 2, cin), lambda b, j: (b, j, 0, 0)),
                # ... plus the next 4 rows (halo); TH % 4 == 0 keeps it blocked.
                pl.BlockSpec((1, 4, w + 2, cin),
                             lambda b, j: (b, (j + 1) * (th // 4), 0, 0)),
                pl.BlockSpec((9 * cin, c1), lambda b, j: (0, 0)),
                pl.BlockSpec((1, c1), lambda b, j: (0, 0)),
                pl.BlockSpec((1, c1), lambda b, j: (0, 0)),
                pl.BlockSpec((9 * c1, c2), lambda b, j: (0, 0)),
                pl.BlockSpec((1, c2), lambda b, j: (0, 0)),
                pl.BlockSpec((1, c2), lambda b, j: (0, 0)),
            ],
            out_specs=pl.BlockSpec((1, th, w, c2), lambda b, j: (b, j, 0, 0)),
            scratch_shapes=[pltpu.VMEM((th + 2, w + 2, c1), jnp.float32)],
        ),
        compiler_params=pltpu.CompilerParams(
            dimension_semantics=("parallel", "parallel"),
            vmem_limit_bytes=32 * 1024 * 1024,
        ),
    )(xp, xp, w1m, s1v, b1v, w2m, s2v, b2v)
    return out[:, :h]


def fold_bn(conv_bias, gamma, beta, running_mean, running_var, eps=1e-5):
    s = gamma / jnp.sqrt(running_var + eps)
    b = beta + (conv_bias - running_mean) * s
    return s, b


def make_params(key, in_ch, out_ch):
    """Deterministic synthetic parameters for double_conv(in_ch, out_ch)."""
    ks = jax.random.split(key, 6)

    def layer(k0, k1, k2, cin, cout):
        w = jax.random.normal(k0, (3, 3, cin, cout), jnp.float32) * 0.1
        cb = jax.random.normal(k1, (cout,), jnp.float32) * 0.05
        gamma = 1.0 + 0.1 * jax.random.normal(k2, (cout,), jnp.float32)
        beta = jnp.linspace(-0.1, 0.1, cout, dtype=jnp.float32)
        rmean = jnp.linspace(-0.05, 0.05, cout, dtype=jnp.float32)
        rvar = jnp.linspace(0.8, 1.2, cout, dtype=jnp.float32)
        return w, cb, gamma, beta, rmean, rvar

    p1 = layer(ks[0], ks[1], ks[2], in_ch, out_ch)
    p2 = layer(ks[3], ks[4], ks[5], out_ch, out_ch)
    return p1, p2


def remain_forward(x_nchw, params, compute_dtype=None, max_row_tile=None):
    """Equivalent of remain(in_ch, out_ch).forward on an NCHW input."""
    x = jnp.transpose(x_nchw, (0, 2, 3, 1))          # NCHW -> NHWC
    (w1, cb1, g1, bt1, rm1, rv1), (w2, cb2, g2, bt2, rm2, rv2) = params
    s1, b1 = fold_bn(cb1, g1, bt1, rm1, rv1)
    s2, b2 = fold_bn(cb2, g2, bt2, rm2, rv2)
    y = double_conv_pallas(x, w1, s1, b1, w2, s2, b2,
                           compute_dtype=compute_dtype,
                           max_row_tile=max_row_tile)
    return jnp.transpose(y, (0, 3, 1, 2))            # NHWC -> NCHW


def _reference(x_nchw, params):
    """Plain-JAX reference (lax.conv) for correctness check."""
    x = jnp.transpose(x_nchw, (0, 2, 3, 1))
    for (w, cb, g, bt, rm, rv) in params:
        y = jax.lax.conv_general_dilated(
            x, w, window_strides=(1, 1), padding="SAME",
            dimension_numbers=("NHWC", "HWIO", "NHWC")) + cb
        y = (y - rm) / jnp.sqrt(rv + 1e-5) * g + bt
        x = jnp.maximum(y, 0.0)
    return jnp.transpose(x, (0, 3, 1, 2))


if __name__ == "__main__":
    in_ch, out_ch = 4, 8
    batch, spatial = 2, 16

    key = jax.random.PRNGKey(0)
    kx, kp = jax.random.split(key)
    x = jax.random.normal(kx, (batch, in_ch, spatial, spatial), jnp.float32)
    params = make_params(kp, in_ch, out_ch)

    ref = _reference(x, params)

    # f32 compute path; row tile forced to 8 so the multi-tile halo/masking
    # path (grid = (2, 2)) is exercised on this small image.
    fwd32 = jax.jit(functools.partial(remain_forward, params=params,
                                      compute_dtype=jnp.float32,
                                      max_row_tile=8))
    out32 = jax.block_until_ready(fwd32(x))
    assert out32.shape == (batch, out_ch, spatial, spatial), out32.shape
    err32 = float(jnp.max(jnp.abs(out32 - ref)))
    assert err32 < 5e-4, err32

    # bf16 activations/weights with f32 MXU accumulation (v5e/v6e/v7x bf16 path).
    fwd16 = jax.jit(functools.partial(remain_forward, params=params,
                                      compute_dtype=jnp.bfloat16,
                                      max_row_tile=8))
    out16 = jax.block_until_ready(fwd16(x))
    err16 = float(jnp.max(jnp.abs(out16.astype(jnp.float32) - ref)))
    assert err16 < 5e-2, err16

    print("KERNEL_OK")
</pallas_src>

<mosaic_0001>
module attributes {stable_mosaic.version = 11 : i64} {
  func.func @_double_conv_kernel(%arg0: i32, %arg1: i32, %arg2: memref<1x8x18x4xf32, #tpu.memory_space<vmem>>, %arg3: memref<1x4x18x4xf32, #tpu.memory_space<vmem>>, %arg4: memref<36x8xf32, #tpu.memory_space<vmem>>, %arg5: memref<1x8xf32, #tpu.memory_space<vmem>>, %arg6: memref<1x8xf32, #tpu.memory_space<vmem>>, %arg7: memref<72x8xf32, #tpu.memory_space<vmem>>, %arg8: memref<1x8xf32, #tpu.memory_space<vmem>>, %arg9: memref<1x8xf32, #tpu.memory_space<vmem>>, %arg10: memref<1x8x16x8xf32, #tpu.memory_space<vmem>>, %arg11: memref<10x18x8xf32, #tpu.memory_space<vmem>>) attributes {dimension_semantics = [#tpu.dimension_semantics<parallel>, #tpu.dimension_semantics<parallel>], iteration_bounds = array<i64: 2, 2>, scalar_prefetch = 0 : i64, scratch_operands = 1 : i64, tpu.core_type = #tpu.core_type<tc>, window_params = [{transform_indices = @transform_0, window_bounds = array<i64: 1, 8, 18, 4>}, {transform_indices = @transform_1, window_bounds = array<i64: 1, 4, 18, 4>}, {pipeline_mode = #tpu.pipeline_mode<synchronous>, transform_indices = @transform_2, window_bounds = array<i64: 36, 8>}, {pipeline_mode = #tpu.pipeline_mode<synchronous>, transform_indices = @transform_3, window_bounds = array<i64: 1, 8>}, {pipeline_mode = #tpu.pipeline_mode<synchronous>, transform_indices = @transform_4, window_bounds = array<i64: 1, 8>}, {pipeline_mode = #tpu.pipeline_mode<synchronous>, transform_indices = @transform_5, window_bounds = array<i64: 72, 8>}, {pipeline_mode = #tpu.pipeline_mode<synchronous>, transform_indices = @transform_6, window_bounds = array<i64: 1, 8>}, {pipeline_mode = #tpu.pipeline_mode<synchronous>, transform_indices = @transform_7, window_bounds = array<i64: 1, 8>}, {transform_indices = @transform_8, window_bounds = array<i64: 1, 8, 16, 8>}]} {
    %c0 = arith.constant 0 : index
    %c0_0 = arith.constant 0 : index
    %c0_1 = arith.constant 0 : index
    %c0_2 = arith.constant 0 : index
    %0 = vector.load %arg2[%c0, %c0_0, %c0_1, %c0_2] : memref<1x8x18x4xf32, #tpu.memory_space<vmem>>, vector<1x8x18x4xf32>
    %1 = vector.shape_cast %0 : vector<1x8x18x4xf32> to vector<8x18x4xf32>
    %c0_3 = arith.constant 0 : index
    %c0_4 = arith.constant 0 : index
    %c0_5 = arith.constant 0 : index
    %c0_6 = arith.constant 0 : index
    %2 = vector.load %arg3[%c0_3, %c0_4, %c0_5, %c0_6] : memref<1x4x18x4xf32, #tpu.memory_space<vmem>>, vector<1x4x18x4xf32>
    %3 = vector.shape_cast %2 : vector<1x4x18x4xf32> to vector<4x18x4xf32>
    %4 = tpu.concatenate %1, %3 in 0 : vector<8x18x4xf32>, vector<4x18x4xf32> -> vector<12x18x4xf32>
    %5 = vector.extract_strided_slice %4 {offsets = [0, 0, 0], sizes = [10, 16, 4], strides = [1, 1, 1]} : vector<12x18x4xf32> to vector<10x16x4xf32>
    %6 = vector.extract_strided_slice %4 {offsets = [0, 1, 0], sizes = [10, 16, 4], strides = [1, 1, 1]} : vector<12x18x4xf32> to vector<10x16x4xf32>
    %7 = vector.extract_strided_slice %4 {offsets = [0, 2, 0], sizes = [10, 16, 4], strides = [1, 1, 1]} : vector<12x18x4xf32> to vector<10x16x4xf32>
    %8 = vector.extract_strided_slice %4 {offsets = [1, 0, 0], sizes = [10, 16, 4], strides = [1, 1, 1]} : vector<12x18x4xf32> to vector<10x16x4xf32>
    %9 = vector.extract_strided_slice %4 {offsets = [1, 1, 0], sizes = [10, 16, 4], strides = [1, 1, 1]} : vector<12x18x4xf32> to vector<10x16x4xf32>
    %10 = vector.extract_strided_slice %4 {offsets = [1, 2, 0], sizes = [10, 16, 4], strides = [1, 1, 1]} : vector<12x18x4xf32> to vector<10x16x4xf32>
    %11 = vector.extract_strided_slice %4 {offsets = [2, 0, 0], sizes = [10, 16, 4], strides = [1, 1, 1]} : vector<12x18x4xf32> to vector<10x16x4xf32>
    %12 = vector.extract_strided_slice %4 {offsets = [2, 1, 0], sizes = [10, 16, 4], strides = [1, 1, 1]} : vector<12x18x4xf32> to vector<10x16x4xf32>
    %13 = vector.extract_strided_slice %4 {offsets = [2, 2, 0], sizes = [10, 16, 4], strides = [1, 1, 1]} : vector<12x18x4xf32> to vector<10x16x4xf32>
    %14 = tpu.concatenate %5, %6, %7, %8, %9, %10, %11, %12, %13 in 2 : vector<10x16x4xf32>, vector<10x16x4xf32>, vector<10x16x4xf32>, vector<10x16x4xf32>, vector<10x16x4xf32>, vector<10x16x4xf32>, vector<10x16x4xf32>, vector<10x16x4xf32>, vector<10x16x4xf32> -> vector<10x16x36xf32>
    %15 = vector.shape_cast %14 : vector<10x16x36xf32> to vector<160x36xf32>
    %c0_7 = arith.constant 0 : index
    %c0_8 = arith.constant 0 : index
    %16 = vector.load %arg4[%c0_7, %c0_8] : memref<36x8xf32, #tpu.memory_space<vmem>>, vector<36x8xf32>
    %cst = arith.constant dense<0.000000e+00> : vector<160x8xf32>
    %17 = tpu.matmul %15, %16, %cst {dimension_numbers = #tpu.dot_dimension_numbers<[1], [0], [0], [1], [0, 0, 1, 1], [], []>} : vector<160x36xf32>, vector<36x8xf32>, vector<160x8xf32> -> vector<160x8xf32>
    %c0_9 = arith.constant 0 : index
    %c0_10 = arith.constant 0 : index
    %18 = vector.load %arg5[%c0_9, %c0_10] : memref<1x8xf32, #tpu.memory_space<vmem>>, vector<1x8xf32>
    %19 = vector.broadcast %18 : vector<1x8xf32> to vector<160x8xf32>
    %20 = arith.mulf %17, %19 : vector<160x8xf32>
    %c0_11 = arith.constant 0 : index
    %c0_12 = arith.constant 0 : index
    %21 = vector.load %arg6[%c0_11, %c0_12] : memref<1x8xf32, #tpu.memory_space<vmem>>, vector<1x8xf32>
    %22 = vector.broadcast %21 : vector<1x8xf32> to vector<160x8xf32>
    %23 = arith.addf %20, %22 : vector<160x8xf32>
    %cst_13 = arith.constant 0.000000e+00 : f32
    %24 = vector.broadcast %cst_13 : f32 to vector<160x8xf32>
    %25 = arith.maximumf %23, %24 : vector<160x8xf32>
    %26 = vector.shape_cast %25 : vector<160x8xf32> to vector<10x16x8xf32>
    %27 = tpu.iota {dimensions = array<i32: 0>} : vector<10x16x8xi32>
    %c8_i32 = arith.constant 8 : i32
    %28 = arith.muli %arg1, %c8_i32 : i32
    %c1_i32 = arith.constant 1 : i32
    %29 = arith.subi %28, %c1_i32 : i32
    %30 = vector.broadcast %29 : i32 to vector<10x16x8xi32>
    %31 = arith.addi %27, %30 : vector<10x16x8xi32>
    %c0_i32 = arith.constant 0 : i32
    %32 = vector.broadcast %c0_i32 : i32 to vector<10x16x8xi32>
    %33 = arith.cmpi sge, %31, %32 : vector<10x16x8xi32>
    %c16_i32 = arith.constant 16 : i32
    %34 = vector.broadcast %c16_i32 : i32 to vector<10x16x8xi32>
    %35 = arith.cmpi slt, %31, %34 : vector<10x16x8xi32>
    %36 = arith.andi %33, %35 : vector<10x16x8xi1>
    %cst_14 = arith.constant 0.000000e+00 : f32
    %37 = vector.broadcast %cst_14 : f32 to vector<10x16x8xf32>
    %38 = arith.select %36, %26, %37 : vector<10x16x8xi1>, vector<10x16x8xf32>
    %cst_15 = arith.constant 0.000000e+00 : f32
    %39 = vector.broadcast %cst_15 : f32 to vector<10x18x8xf32>
    %c0_16 = arith.constant 0 : index
    %c0_17 = arith.constant 0 : index
    %c0_18 = arith.constant 0 : index
    %40 = vector.load %arg11[%c0_16, %c0_17, %c0_18] : memref<10x18x8xf32, #tpu.memory_space<vmem>>, vector<10x18x8xf32>
    tpu.vector_store %arg11[%c0_16, %c0_17, %c0_18], %39 {strides = array<i32>} : memref<10x18x8xf32, #tpu.memory_space<vmem>>, vector<10x18x8xf32>,
    %c0_19 = arith.constant 0 : index
    %c1 = arith.constant 1 : index
    %c0_20 = arith.constant 0 : index
    %41 = vector.load %arg11[%c0_19, %c1, %c0_20] : memref<10x18x8xf32, #tpu.memory_space<vmem>>, vector<10x16x8xf32>
    tpu.vector_store %arg11[%c0_19, %c1, %c0_20], %38 {strides = array<i32>} : memref<10x18x8xf32, #tpu.memory_space<vmem>>, vector<10x16x8xf32>,
    %c0_21 = arith.constant 0 : index
    %c0_22 = arith.constant 0 : index
    %c0_23 = arith.constant 0 : index
    %42 = vector.load %arg11[%c0_21, %c0_22, %c0_23] : memref<10x18x8xf32, #tpu.memory_space<vmem>>, vector<8x16x8xf32>
    %c0_24 = arith.constant 0 : index
    %c1_25 = arith.constant 1 : index
    %c0_26 = arith.constant 0 : index
    %43 = vector.load %arg11[%c0_24, %c1_25, %c0_26] : memref<10x18x8xf32, #tpu.memory_space<vmem>>, vector<8x16x8xf32>
    %c0_27 = arith.constant 0 : index
    %c2 = arith.constant 2 : index
    %c0_28 = arith.constant 0 : index
    %44 = vector.load %arg11[%c0_27, %c2, %c0_28] : memref<10x18x8xf32, #tpu.memory_space<vmem>>, vector<8x16x8xf32>
    %c1_29 = arith.constant 1 : index
    %c0_30 = arith.constant 0 : index
    %c0_31 = arith.constant 0 : index
    %45 = vector.load %arg11[%c1_29, %c0_30, %c0_31] : memref<10x18x8xf32, #tpu.memory_space<vmem>>, vector<8x16x8xf32>
    %c1_32 = arith.constant 1 : index
    %c1_33 = arith.constant 1 : index
    %c0_34 = arith.constant 0 : index
    %46 = vector.load %arg11[%c1_32, %c1_33, %c0_34] : memref<10x18x8xf32, #tpu.memory_space<vmem>>, vector<8x16x8xf32>
    %c1_35 = arith.constant 1 : index
    %c2_36 = arith.constant 2 : index
    %c0_37 = arith.constant 0 : index
    %47 = vector.load %arg11[%c1_35, %c2_36, %c0_37] : memref<10x18x8xf32, #tpu.memory_space<vmem>>, vector<8x16x8xf32>
    %c2_38 = arith.constant 2 : index
    %c0_39 = arith.constant 0 : index
    %c0_40 = arith.constant 0 : index
    %48 = vector.load %arg11[%c2_38, %c0_39, %c0_40] : memref<10x18x8xf32, #tpu.memory_space<vmem>>, vector<8x16x8xf32>
    %c2_41 = arith.constant 2 : index
    %c1_42 = arith.constant 1 : index
    %c0_43 = arith.constant 0 : index
    %49 = vector.load %arg11[%c2_41, %c1_42, %c0_43] : memref<10x18x8xf32, #tpu.memory_space<vmem>>, vector<8x16x8xf32>
    %c2_44 = arith.constant 2 : index
    %c2_45 = arith.constant 2 : index
    %c0_46 = arith.constant 0 : index
    %50 = vector.load %arg11[%c2_44, %c2_45, %c0_46] : memref<10x18x8xf32, #tpu.memory_space<vmem>>, vector<8x16x8xf32>
    %51 = tpu.concatenate %42, %43, %44, %45, %46, %47, %48, %49, %50 in 2 : vector<8x16x8xf32>, vector<8x16x8xf32>, vector<8x16x8xf32>, vector<8x16x8xf32>, vector<8x16x8xf32>, vector<8x16x8xf32>, vector<8x16x8xf32>, vector<8x16x8xf32>, vector<8x16x8xf32> -> vector<8x16x72xf32>
    %52 = vector.shape_cast %51 : vector<8x16x72xf32> to vector<128x72xf32>
    %c0_47 = arith.constant 0 : index
    %c0_48 = arith.constant 0 : index
    %53 = vector.load %arg7[%c0_47, %c0_48] : memref<72x8xf32, #tpu.memory_space<vmem>>, vector<72x8xf32>
    %cst_49 = arith.constant dense<0.000000e+00> : vector<128x8xf32>
    %54 = tpu.matmul %52, %53, %cst_49 {dimension_numbers = #tpu.dot_dimension_numbers<[1], [0], [0], [1], [0, 0, 1, 1], [], []>} : vector<128x72xf32>, vector<72x8xf32>, vector<128x8xf32> -> vector<128x8xf32>
    %c0_50 = arith.constant 0 : index
    %c0_51 = arith.constant 0 : index
    %55 = vector.load %arg8[%c0_50, %c0_51] : memref<1x8xf32, #tpu.memory_space<vmem>>, vector<1x8xf32>
    %56 = vector.broadcast %55 : vector<1x8xf32> to vector<128x8xf32>
    %57 = arith.mulf %54, %56 : vector<128x8xf32>
    %c0_52 = arith.constant 0 : index
    %c0_53 = arith.constant 0 : index
    %58 = vector.load %arg9[%c0_52, %c0_53] : memref<1x8xf32, #tpu.memory_space<vmem>>, vector<1x8xf32>
    %59 = vector.broadcast %58 : vector<1x8xf32> to vector<128x8xf32>
    %60 = arith.addf %57, %59 : vector<128x8xf32>
    %cst_54 = arith.constant 0.000000e+00 : f32
    %61 = vector.broadcast %cst_54 : f32 to vector<128x8xf32>
    %62 = arith.maximumf %60, %61 : vector<128x8xf32>
    %63 = vector.shape_cast %62 : vector<128x8xf32> to vector<8x16x8xf32>
    %c0_55 = arith.constant 0 : index
    %c0_56 = arith.constant 0 : index
    %c0_57 = arith.constant 0 : index
    %c0_58 = arith.constant 0 : index
    %64 = vector.load %arg10[%c0_55, %c0_56, %c0_57, %c0_58] : memref<1x8x16x8xf32, #tpu.memory_space<vmem>>, vector<1x8x16x8xf32>
    %65 = vector.shape_cast %64 : vector<1x8x16x8xf32> to vector<8x16x8xf32>
    %66 = vector.shape_cast %63 : vector<8x16x8xf32> to vector<1x8x16x8xf32>
    tpu.vector_store %arg10[%c0_55, %c0_56, %c0_57, %c0_58], %66 {strides = array<i32>} : memref<1x8x16x8xf32, #tpu.memory_space<vmem>>, vector<1x8x16x8xf32>,
    return
  }
  func.func @transform_0(%arg0: i32, %arg1: i32) -> (i32, i32, i32, i32) {
    %c0_i32 = arith.constant 0 : i32
    %c0_i32_0 = arith.constant 0 : i32
    %c0_i32_1 = arith.constant 0 : i32
    return %arg0, %arg1, %c0_i32, %c0_i32_0 : i32, i32, i32, i32
  }
  func.func @transform_1(%arg0: i32, %arg1: i32) -> (i32, i32, i32, i32) {
    %c1_i32 = arith.constant 1 : i32
    %0 = arith.addi %arg1, %c1_i32 : i32
    %c2_i32 = arith.constant 2 : i32
    %1 = arith.muli %0, %c2_i32 : i32
    %c0_i32 = arith.constant 0 : i32
    %c0_i32_0 = arith.constant 0 : i32
    %c0_i32_1 = arith.constant 0 : i32
    return %arg0, %1, %c0_i32, %c0_i32_0 : i32, i32, i32, i32
  }
  func.func @transform_2(%arg0: i32, %arg1: i32) -> (i32, i32) {
    %c0_i32 = arith.constant 0 : i32
    %c0_i32_0 = arith.constant 0 : i32
    %c0_i32_1 = arith.constant 0 : i32
    return %c0_i32, %c0_i32_0 : i32, i32
  }
  func.func @transform_3(%arg0: i32, %arg1: i32) -> (i32, i32) {
    %c0_i32 = arith.constant 0 : i32
    %c0_i32_0 = arith.constant 0 : i32
    %c0_i32_1 = arith.constant 0 : i32
    return %c0_i32, %c0_i32_0 : i32, i32
  }
  func.func @transform_4(%arg0: i32, %arg1: i32) -> (i32, i32) {
    %c0_i32 = arith.constant 0 : i32
    %c0_i32_0 = arith.constant 0 : i32
    %c0_i32_1 = arith.constant 0 : i32
    return %c0_i32, %c0_i32_0 : i32, i32
  }
  func.func @transform_5(%arg0: i32, %arg1: i32) -> (i32, i32) {
    %c0_i32 = arith.constant 0 : i32
    %c0_i32_0 = arith.constant 0 : i32
    %c0_i32_1 = arith.constant 0 : i32
    return %c0_i32, %c0_i32_0 : i32, i32
  }
  func.func @transform_6(%arg0: i32, %arg1: i32) -> (i32, i32) {
    %c0_i32 = arith.constant 0 : i32
    %c0_i32_0 = arith.constant 0 : i32
    %c0_i32_1 = arith.constant 0 : i32
    return %c0_i32, %c0_i32_0 : i32, i32
  }
  func.func @transform_7(%arg0: i32, %arg1: i32) -> (i32, i32) {
    %c0_i32 = arith.constant 0 : i32
    %c0_i32_0 = arith.constant 0 : i32
    %c0_i32_1 = arith.constant 0 : i32
    return %c0_i32, %c0_i32_0 : i32, i32
  }
  func.func @transform_8(%arg0: i32, %arg1: i32) -> (i32, i32, i32, i32) {
    %c0_i32 = arith.constant 0 : i32
    %c0_i32_0 = arith.constant 0 : i32
    %c0_i32_1 = arith.constant 0 : i32
    return %arg0, %arg1, %c0_i32, %c0_i32_0 : i32, i32, i32, i32
  }
}

</mosaic_0001>

<bundles_post_ra>
// kernel: remain_forward.1
= control target key start
LH: loop header
LB: loop body
LE: loop exit
PB: predicated region body
PF: predicated region fallthrough
CT: control target
= control target key end

     0   :  { %s3241_s27 = smov 0   ;;  %s3243_s28 = smov 0   ;;  %s4779_s0 = inlined_call_operand.vmem [shape: f32[2,20,18,4], index: 0, kind: input, shape index: {}, may-alias: {0,1}]   ;;  %s4780_s1 = inlined_call_operand.vmem [shape: f32[2,20,18,4], index: 1, kind: input, shape index: {}, may-alias: {0,1}]   ;;  %s4781_s2 = inlined_call_operand.vmem [shape: f32[36,8], index: 2, kind: input, shape index: {}]   ;;  %s4782_s3 = inlined_call_operand.vmem [shape: f32[1,8], index: 3, kind: input, shape index: {}]   ;;  %s4783_s4 = inlined_call_operand.vmem [shape: f32[1,8], index: 4, kind: input, shape index: {}]   ;;  %s4784_s5 = inlined_call_operand.vmem [shape: f32[72,8], index: 5, kind: input, shape index: {}]   ;;  %s4785_s6 = inlined_call_operand.vmem [shape: f32[1,8], index: 6, kind: input, shape index: {}]   ;;  %s4786_s7 = inlined_call_operand.vmem [shape: f32[1,8], index: 7, kind: input, shape index: {}]   ;;  %s4787_s8 = inlined_call_operand.vmem [shape: f32[2,16,16,8], index: 8, kind: output, shape index: {}]  }
   0x1   :  { %s3245_s29 = smov 0   ;;  %s3247_s30 = smov 0  }
   0x2   :  { %s3249_s9 = smov 0  }
   0x3 LB: > { %s27_s10 = sadd.s32 1, %s3173_s29  ;;  %s30_s11 = sadd.s32 1, %s3177_s30  ;;  %s3181_s9 = sphi %s3249_s9, %s18_s9   ;;  %s3177_s30 = sphi %s3247_s30, %s4793_s30   ;;  %s3173_s29 = sphi %s3245_s29, %s4792_s29   ;;  %s3169_s28 = sphi %s3243_s28, %s4791_s28   ;;  %s3165_s27 = sphi %s3241_s27, %s4790_s27  }
   0x4   : > { %p28_p0 = scmp.ge.s32.totalorder %s27_s10, 2  ;;  %p2889_p1 = scmp.ge.s32.totalorder %s3181_s9, 1 }
   0x5   : > { %p320_p2 = scmp.lt.s32.totalorder %s3181_s9, 5 }
   0x6   : > { %s4795_s10 = smov (%p28_p0, %s27_s10), 0  ;;  %s4797_s11 = smov (!%p28_p0, %s30_s11), %s3177_s30 }
   0x7   : > { %p321_p3 = pnand %p2889_p1, %p320_p2  ;;  %p32_p4 = scmp.ge.s32.totalorder %s4797_s11, 2 }
   0x8   : > { %s3271_s12 = sshll.u32 (!%p321_p3), %s3165_s27, 3  ;;  %p387_p5 = scmp.lt.s32.totalorder (!%p321_p3), %s3169_s28, 1 }
   0x9   : > { %s4799_s11 = smov (%p32_p4, %s4797_s11), 0  ;;  %324 = sbr.rel (%p321_p3) target bundleno = 1008 (0x3f0), region = 52 }
   0xa   : > { %p389_p6 = scmp.lt.s32.totalorder (!%p321_p3), %s3271_s12, 19  ;;  %s3183_s21 = smov (!%p321_p3), 12  }
   0xb   : > { %s3184_s22 = smov (!%p321_p3), 8   ;;  %s3185_s23 = smov (!%p321_p3), 4  }
   0xc   : > { %s3186_s24 = smov (!%p321_p3), 16   ;;  %s3187_s25 = smov (!%p321_p3), 20  }
   0xd   : > { %s3188_s26 = smov (!%p321_p3), 24   ;;  %s2952_s18 = sadd.s32 (!%p321_p3), 8, %s3271_s12 }
   0xe   : > { %s4801_s28 = smov (!%p387_p5, %s3169_s28), 1  ;;  %vm605_vm0 = vcmask 1045504   ;;  %vm494_vm1 = vcmask 1046528   ;;  %v1274_v28 = vld [vmem:[%s4781_s2 + $0x20] sm:$0xf]  ;;  %vm1336_vm2 = vcmask 1043456  }
   0xf   : > { %s390_s13 = scalar_select %p389_p6, %s3271_s12, 19  ;;  %3003 = vmatprep.subr.msk.mxu0 %vm1336_vm2, %v1274_v28  ;;  %v1273_v31 = vld [vmem:[%s4781_s2 + $0x18] sm:$0xff]  ;;  %v1272_v33 = vld [vmem:[%s4781_s2 + $0x10] sm:$0xff]  ;;  %v1271_v35 = vld [vmem:[%s4781_s2 + $0x8] sm:$0xff]  ;;  %vm1102_vm3 = vcmask 31744   ;;  %vm1123_vm4 = vcmask 64512  }
  0x10   : > { %s3086_s14 = smul.u32 60, %s4801_s28  ;;  %3004 = vmatpush3.msk.msra.mxu0 %vm1336_vm2, %v1274_v28  ;;  %v1270_v39 = vld [vmem:[%s4781_s2] sm:$0xff]  ;;  %vm1144_vm5 = vcmask 97280   ;;  %vm1165_vm6 = vcmask 130048   ;;  %vm1186_vm7 = vcmask 162816   ;;  %vm1207_vm8 = vcmask 195584  }
  0x11   : > { %s3085_s15 = smul.u32 3, %s390_s13  ;;  %3005 = vmatprep.subr.mxu0 %v1273_v31  ;;  %s3189_s13 = smov 28   ;;  %vm1228_vm9 = vcmask 228352   ;;  %vm1249_vm10 = vcmask 261120   ;;  %vm1275_vm11 = vcmask 293888   ;;  %vm1643_vm12 = vcmask 58368  }
  0x12   : > { %3006 = vmatpush3.msra.mxu0 %v1273_v31  ;;  %p407_p7 = scmp.lt.s32.totalorder %s2952_s18, 19  ;;  %p420_p8 = scmp.lt.s32.totalorder %s3271_s12, 15 }
  0x13   : > { %s393_s16 = sadd.s32 %s3086_s14, %s3085_s15  ;;  %3007 = vmatprep.subr.mxu0 %v1272_v33 }
  0x14   : > { %s2891_s17 = sshll.u32 %s393_s16, 3  ;;  %3008 = vmatpush3.msra.mxu0 %v1272_v33  ;;  %s4803_s18 = smov (!%p407_p7, %s2952_s18), 19 }
  0x15   : > { %s3283_s20 = scalar_lea.vmem %s4779_s0, %s2891_s17  ;;  %3009 = vmatprep.subr.mxu0 %v1271_v35  ;;  %s3190_s17 = smov 32  }
  0x16   : > { %v3286_v0 = vld [vmem:[%s3283_s20 + $0x20] sm:$0xff]  ;;  %v3289_v1 = vld [vmem:[%s3283_s20 + $0x18] sm:$0xff]  ;;  %v3299_v3 = vld [vmem:[%s3283_s20 + $0x8] sm:$0xff]  ;;  %3010 = vmatpush3.msra.mxu0 %v1271_v35 }
  0x17   : > { %v3292_v2 = vld [vmem:[%s3283_s20] sm:$0xff]  ;;  %720 = vrot.lane.b32.xlu1 %v3286_v0, %s3183_s21  ;;  %718 = vrot.lane.b32.xlu0 %v3289_v1, %s3183_s21  ;;  %v430_v6 = vld [vmem:[%s3283_s20 + $0x10] sm:$0x3]  ;;  %v607_v7 = vrot.slane %v3299_v3, 2  ;;  %v496_v8 = vrot.slane %v3299_v3, 1  ;;  %v500_v15 = vrot.slane %v3289_v1, 1 }
  0x18   : > { %v606_v4 = vrot.slane %v3292_v2, 2  ;;  %v495_v5 = vrot.slane %v3292_v2, 1  ;;  %v609_v9 = vrot.slane %v430_v6, 2  ;;  %v498_v10 = vrot.slane %v430_v6, 1  ;;  %v433_v17 = vld [vmem:[%s3283_s20 + $0x28] sm:$0x3]  ;;  %3011 = vmatprep.subr.mxu0 %v1270_v39 }
  0x19   : > { %v501_v16 = vrot.slane %v3286_v0, 1  ;;  %v611_v19 = vrot.slane %v3289_v1, 2  ;;  %v612_v20 = vrot.slane %v3286_v0, 2  ;;  %v503_v21 = vrot.slane %v433_v17, 1  ;;  %v3329_v25 = vld [vmem:[%s3283_s20 + $0x30] sm:$0xff]  ;;  %v3333_v27 = vld [vmem:[%s3283_s20 + $0x38] sm:$0xff]  ;;  %3012 = vmatpush3.msra.mxu0 %v1270_v39 }
  0x1a   : > { %v608_v11 = vsel %vm605_vm0, %v606_v4, %v607_v7  ;;  %v497_v12 = vsel %vm494_vm1, %v495_v5, %v496_v8  ;;  %v610_v13 = vsel %vm605_vm0, %v607_v7, %v609_v9  ;;  %v499_v14 = vsel %vm494_vm1, %v496_v8, %v498_v10  ;;  %v436_v34 = vld [vmem:[%s3283_s20 + $0x40] sm:$0x3]  ;;  %v3380_v44 = vld [vmem:[%s3283_s20 + $0x48] sm:$0xff]  ;;  %v3383_v45 = vld [vmem:[%s3283_s20 + $0x50] sm:$0xff] }
  0x1b   : > { %656 = vrot.lane.b32.xlu1 %v608_v11, %s3184_s22  ;;  %545 = vrot.lane.b32.xlu0 %v497_v12, %s3185_s23  ;;  %v502_v18 = vsel %vm494_vm1, %v500_v15, %v501_v16  ;;  %v613_v22 = vsel %vm605_vm0, %v611_v19, %v612_v20  ;;  %v504_v23 = vsel %vm494_vm1, %v501_v16, %v503_v21  ;;  %v614_v24 = vrot.slane %v433_v17, 2  ;;  %v439_v49 = vld [vmem:[%s3283_s20 + $0x58] sm:$0x3]  ;;  %v3415_v57 = vld [vmem:[%s3283_s20 + $0x60] sm:$0xff] }
  0x1c   : > { %v505_v29 = vrot.slane %v3329_v25, 1  ;;  %v506_v30 = vrot.slane %v3333_v27, 1  ;;  %v616_v36 = vrot.slane %v3329_v25, 2  ;;  %v617_v37 = vrot.slane %v3333_v27, 2  ;;  %v3418_v58 = vld [vmem:[%s3283_s20 + $0x68] sm:$0xff]  ;;  %v3452_v12 = vld [vmem:[%s3283_s20 + $0x78] sm:$0xff] }
  0x1d   : > { %v615_v26 = vsel %vm605_vm0, %v612_v20, %v614_v24  ;;  %v508_v38 = vrot.slane %v436_v34, 1  ;;  %v619_v42 = vrot.slane %v436_v34, 2  ;;  %v510_v46 = vrot.slane %v3380_v44, 1  ;;  %v442_v62 = vld [vmem:[%s3283_s20 + $0x70] sm:$0x3]  ;;  %v3455_v15 = vld [vmem:[%s3283_s20 + $0x80] sm:$0xff] }
  0x1e   : > { %v507_v32 = vsel %vm494_vm1, %v505_v29, %v506_v30  ;;  %v618_v40 = vsel %vm605_vm0, %v616_v36, %v617_v37  ;;  %v511_v47 = vrot.slane %v3383_v45, 1  ;;  %v621_v50 = vrot.slane %v3380_v44, 2 }
  0x1f   : > { %658 = vrot.lane.b32.xlu1 %v610_v13, %s3184_s22  ;;  %547 = vrot.lane.b32.xlu0 %v499_v14, %s3185_s23  ;;  %v509_v41 = vsel %vm494_vm1, %v506_v30, %v508_v38  ;;  %v620_v43 = vsel %vm605_vm0, %v617_v37, %v619_v42  ;;  %v622_v51 = vrot.slane %v3383_v45, 2  ;;  %v513_v52 = vrot.slane %v439_v49, 1 }
  0x20   : > { %v512_v48 = vsel %vm494_vm1, %v510_v46, %v511_v47  ;;  %v624_v55 = vrot.slane %v439_v49, 2  ;;  %v515_v59 = vrot.slane %v3415_v57, 1  ;;  %v516_v60 = vrot.slane %v3418_v58, 1 }
  0x21   : > { %v623_v53 = vsel %vm605_vm0, %v621_v50, %v622_v51  ;;  %v514_v54 = vsel %vm494_vm1, %v511_v47, %v513_v52  ;;  %v626_v63 = vrot.slane %v3415_v57, 2  ;;  %v627_v4 = vrot.slane %v3418_v58, 2  ;;  %v3502_v47 = vld [vmem:[%s3283_s20 + $0x90] sm:$0xff]  ;;  %v3510_v50 = vld [vmem:[%s3283_s20 + $0x98] sm:$0xff] }
  0x22   : > { %v625_v56 = vsel %vm605_vm0, %v622_v51, %v624_v55  ;;  %v517_v61 = vsel %vm494_vm1, %v515_v59, %v516_v60  ;;  %v518_v5 = vrot.slane %v442_v62, 1  ;;  %v629_v8 = vrot.slane %v442_v62, 2 }
  0x23   : > { %549 = vrot.lane.b32.xlu1 %v502_v18, %s3185_s23  ;;  %784 = vrot.lane.b32.xlu0 %v502_v18, %s3186_s24  ;;  %v628_v6 = vsel %vm605_vm0, %v626_v63, %v627_v4  ;;  %v520_v16 = vrot.slane %v3452_v12, 1  ;;  %v521_v17 = vrot.slane %v3455_v15, 1  ;;  %v631_v24 = vrot.slane %v3452_v12, 2 }
  0x24   : > { %v519_v7 = vsel %vm494_vm1, %v516_v60, %v518_v5  ;;  %v630_v9 = vsel %vm605_vm0, %v627_v4, %v629_v8  ;;  %v525_v55 = vrot.slane %v3502_v47, 1 }
  0x25   : > { %v522_v20 = vsel %vm494_vm1, %v520_v16, %v521_v17 }
  0x27   : > { %849 = vrot.lane.b32.xlu1 %v613_v22, %s3187_s25  ;;  %786 = vrot.lane.b32.xlu0 %v504_v23, %s3186_s24 }
  0x2b   : > { %660 = vrot.lane.b32.xlu1 %v613_v22, %s3184_s22  ;;  %551 = vrot.lane.b32.xlu0 %v504_v23, %s3185_s23  ;;  %v445_v23 = vld [vmem:[%s3283_s20 + $0x88] sm:$0x3] }
  0x2c   : > { %v523_v28 = vrot.slane %v445_v23, 1  ;;  %v634_v35 = vrot.slane %v445_v23, 2 }
  0x2f   : > { %911 = vrot.lane.b32.xlu1 %v3329_v25, %s3188_s26  ;;  %851 = vrot.lane.b32.xlu0 %v615_v26, %s3187_s25 }
  0x33   : > { %722 = vrot.lane.b32.xlu1 %v3329_v25, %s3183_s21  ;;  %662 = vrot.lane.b32.xlu0 %v615_v26, %s3184_s22  ;;  %v632_v26 = vrot.slane %v3455_v15, 2 }
  0x35   : > { %v633_v31 = vsel %vm605_vm0, %v631_v24, %v632_v26  ;;  %v635_v38 = vsel %vm605_vm0, %v632_v26, %v634_v35 }
  0x37   : > { %977 = vrot.lane.b32.xlu1 %v507_v32, %s3189_s13  ;;  %913 = vrot.lane.b32.xlu0 %v3333_v27, %s3188_s26 }
  0x3b   : > { %788 = vrot.lane.b32.xlu1 %v507_v32, %s3186_s24  ;;  %724 = vrot.lane.b32.xlu0 %v3333_v27, %s3183_s21 }
  0x3f   : > { %1042 = vrot.lane.b32.xlu1 %v618_v40, %s3190_s17  ;;  %979 = vrot.lane.b32.xlu0 %v509_v41, %s3189_s13 }
  0x43   : > { %790 = vrot.lane.b32.xlu1 %v509_v41, %s3186_s24  ;;  %553 = vrot.lane.b32.xlu0 %v507_v32, %s3185_s23  ;;  %v524_v32 = vsel %vm494_vm1, %v521_v17, %v523_v28 }
  0x47   : > { %1044 = vrot.lane.b32.xlu1 %v620_v43, %s3190_s17  ;;  %853 = vrot.lane.b32.xlu0 %v618_v40, %s3187_s25 }
  0x4b   : > { %664 = vrot.lane.b32.xlu1 %v618_v40, %s3184_s22  ;;  %555 = vrot.lane.b32.xlu0 %v509_v41, %s3185_s23 }
  0x4f   : > { %915 = vrot.lane.b32.xlu1 %v3380_v44, %s3188_s26  ;;  %855 = vrot.lane.b32.xlu0 %v620_v43, %s3187_s25 }
  0x53   : > { %726 = vrot.lane.b32.xlu1 %v3380_v44, %s3183_s21  ;;  %666 = vrot.lane.b32.xlu0 %v620_v43, %s3184_s22 }
  0x57   : > { %981 = vrot.lane.b32.xlu1 %v512_v48, %s3189_s13  ;;  %917 = vrot.lane.b32.xlu0 %v3383_v45, %s3188_s26 }
  0x5b   : > { %792 = vrot.lane.b32.xlu1 %v512_v48, %s3186_s24  ;;  %728 = vrot.lane.b32.xlu0 %v3383_v45, %s3183_s21 }
  0x5f   : > { %1046 = vrot.lane.b32.xlu1 %v623_v53, %s3190_s17  ;;  %983 = vrot.lane.b32.xlu0 %v514_v54, %s3189_s13 }
  0x63   : > { %794 = vrot.lane.b32.xlu1 %v514_v54, %s3186_s24  ;;  %557 = vrot.lane.b32.xlu0 %v512_v48, %s3185_s23 }
  0x67   : > { %1048 = vrot.lane.b32.xlu1 %v625_v56, %s3190_s17  ;;  %857 = vrot.lane.b32.xlu0 %v623_v53, %s3187_s25 }
  0x6b   : > { %668 = vrot.lane.b32.xlu1 %v623_v53, %s3184_s22  ;;  %559 = vrot.lane.b32.xlu0 %v514_v54, %s3185_s23 }
  0x6f   : > { %919 = vrot.lane.b32.xlu1 %v3415_v57, %s3188_s26  ;;  %859 = vrot.lane.b32.xlu0 %v625_v56, %s3187_s25 }
  0x73   : > { %730 = vrot.lane.b32.xlu1 %v3415_v57, %s3183_s21  ;;  %670 = vrot.lane.b32.xlu0 %v625_v56, %s3184_s22  ;;  %v526_v56 = vrot.slane %v3510_v50, 1 }
  0x75   : > { %v527_v63 = vsel %vm494_vm1, %v525_v55, %v526_v56 }
  0x77   : > { %985 = vrot.lane.b32.xlu1 %v517_v61, %s3189_s13  ;;  %921 = vrot.lane.b32.xlu0 %v3418_v58, %s3188_s26 }
  0x7b   : > { %796 = vrot.lane.b32.xlu1 %v517_v61, %s3186_s24  ;;  %732 = vrot.lane.b32.xlu0 %v3418_v58, %s3183_s21 }
  0x7f   : > { %1050 = vrot.lane.b32.xlu1 %v628_v6, %s3190_s17  ;;  %987 = vrot.lane.b32.xlu0 %v519_v7, %s3189_s13 }
  0x83   : > { %798 = vrot.lane.b32.xlu1 %v519_v7, %s3186_s24  ;;  %561 = vrot.lane.b32.xlu0 %v517_v61, %s3185_s23 }
  0x87   : > { %1052 = vrot.lane.b32.xlu1 %v630_v9, %s3190_s17  ;;  %861 = vrot.lane.b32.xlu0 %v628_v6, %s3187_s25 }
  0x89   : > { %v3447_v10 = vpop.permute.xlu1 %720  ;;  %v719_v11 = vpop.permute.xlu0 %718 }
  0x8b   : > { %672 = vrot.lane.b32.xlu1 %v628_v6, %s3184_s22  ;;  %563 = vrot.lane.b32.xlu0 %v519_v7, %s3185_s23  ;;  %v448_v7 = vld [vmem:[%s3283_s20 + $0xa0] sm:$0x3] }
  0x8c   : > { %v639_v26 = vrot.slane %v448_v7, 2 }
  0x8d   : > { %v657_v13 = vpop.permute.xlu1 %656  ;;  %v546_v14 = vpop.permute.xlu0 %545 }
  0x8e   : > { %v1103_v41 = vsel %vm1102_vm3, %v3292_v2, %v546_v14  ;;  %v528_v14 = vrot.slane %v448_v7, 1 }
  0x8f   : > { %923 = vrot.lane.b32.xlu1 %v3452_v12, %s3188_s26  ;;  %863 = vrot.lane.b32.xlu0 %v630_v9, %s3187_s25  ;;  %v1124_v46 = vsel %vm1123_vm4, %v1103_v41, %v657_v13  ;;  %v636_v13 = vrot.slane %v3502_v47, 2  ;;  %v3577_v41 = vld [vmem:[%s3283_s20 + $0xa8] sm:$0xff] }
  0x90   : > { %v1145_v2 = vsel %vm1144_vm5, %v1124_v46, %v719_v11 }
  0x91   : > { %v3462_v18 = vpop.permute.xlu1 %658  ;;  %v548_v19 = vpop.permute.xlu0 %547 }
  0x92   : > { %v1104_v52 = vsel %vm1102_vm3, %v3299_v3, %v548_v19 }
  0x93   : > { %734 = vrot.lane.b32.xlu1 %v3452_v12, %s3183_s21  ;;  %674 = vrot.lane.b32.xlu0 %v630_v9, %s3184_s22  ;;  %v1125_v3 = vsel %vm1123_vm4, %v1104_v52, %v3462_v18 }
  0x94   : > { %v1146_v4 = vsel %vm1144_vm5, %v1125_v3, %v3447_v10  ;;  %v637_v10 = vrot.slane %v3510_v50, 2 }
  0x95   : > { %v3468_v21 = vpop.permute.xlu1 %549  ;;  %v785_v22 = vpop.permute.xlu0 %784 }
  0x96   : > { %v1166_v51 = vsel %vm1165_vm6, %v1145_v2, %v785_v22  ;;  %v529_v22 = vsel %vm494_vm1, %v526_v56, %v528_v14  ;;  %v3586_v2 = vld [vmem:[%s3283_s20 + $0xb0] sm:$0xff] }
  0x97   : > { %989 = vrot.lane.b32.xlu1 %v522_v20, %s3189_s13  ;;  %925 = vrot.lane.b32.xlu0 %v3455_v15, %s3188_s26 }
  0x99   : > { %v850_v29 = vpop.permute.xlu1 %849  ;;  %v787_v30 = vpop.permute.xlu0 %786 }
  0x9a   : > { %v1187_v53 = vsel %vm1186_vm7, %v1166_v51, %v850_v29  ;;  %v1167_v8 = vsel %vm1165_vm6, %v1146_v4, %v787_v30  ;;  %v640_v30 = vsel %vm605_vm0, %v637_v10, %v639_v26  ;;  %v531_v51 = vrot.slane %v3586_v2, 1 }
  0x9b   : > { %800 = vrot.lane.b32.xlu1 %v522_v20, %s3186_s24  ;;  %736 = vrot.lane.b32.xlu0 %v3455_v15, %s3183_s21 }
  0x9d   : > { %v3481_v33 = vpop.permute.xlu1 %660  ;;  %v3483_v34 = vpop.permute.xlu0 %551 }
  0x9e   : > { %v1106_v55 = vsel %vm1102_vm3, %v3286_v0, %v3483_v34  ;;  %v451_v0 = vld [vmem:[%s3283_s20 + $0xb8] sm:$0x3]  ;;  %s3087_s20 = smul.u32 3, %s4803_s18 }
  0x9f   : > { %1054 = vrot.lane.b32.xlu1 %v633_v31, %s3190_s17  ;;  %991 = vrot.lane.b32.xlu0 %v524_v32, %s3189_s13  ;;  %v533_v4 = vrot.slane %v451_v0, 1 }
  0xa0   : > { %s411_s19 = sadd.s32 %s3087_s20, %s3086_s14  ;;  %s2923_s14 = sadd.s32 4294967295, %s3271_s12 }
  0xa1   : > { %v912_v36 = vpop.permute.xlu1 %911  ;;  %v852_v37 = vpop.permute.xlu0 %851  ;;  %s2894_s27 = sshll.u32 %s411_s19, 3  ;;  %s3192_s20 = smov 40  }
  0xa2   : > { %v1208_v54 = vsel %vm1207_vm8, %v1187_v53, %v912_v36  ;;  %v1188_v9 = vsel %vm1186_vm7, %v1167_v8, %v852_v37  ;;  %v1105_v37 = vsel %vm1102_vm3, %v3289_v1, %v3468_v21  ;;  %s3654_s18 = scalar_lea.vmem %s4780_s1, %s2894_s27  ;;  %s3195_s27 = smov 64  }
  0xa3   : > { %802 = vrot.lane.b32.xlu1 %v524_v32, %s3186_s24  ;;  %565 = vrot.lane.b32.xlu0 %v522_v20, %s3185_s23  ;;  %v638_v20 = vsel %vm605_vm0, %v636_v13, %v637_v10  ;;  %v534_v13 = vsel %vm494_vm1, %v531_v51, %v533_v4  ;;  %s4805_s12 = smov (!%p420_p8, %s3271_s12), 15 }
  0xa5   : > { %v3490_v39 = vpop.permute.xlu1 %722  ;;  %v3492_v40 = vpop.permute.xlu0 %662 }
  0xa6   : > { %v1127_v56 = vsel %vm1123_vm4, %v1106_v55, %v3492_v40 }
  0xa7   : > { %1056 = vrot.lane.b32.xlu1 %v635_v38, %s3190_s17  ;;  %865 = vrot.lane.b32.xlu0 %v633_v31, %s3187_s25 }
  0xa9   : > { %v978_v42 = vpop.permute.xlu1 %977  ;;  %v914_v43 = vpop.permute.xlu0 %913 }
  0xaa   : > { %v1229_v59 = vsel %vm1228_vm9, %v1208_v54, %v978_v42  ;;  %v1209_v11 = vsel %vm1207_vm8, %v1188_v9, %v914_v43 }
  0xab   : > { %676 = vrot.lane.b32.xlu1 %v633_v31, %s3184_s22  ;;  %567 = vrot.lane.b32.xlu0 %v524_v32, %s3185_s23 }
  0xad   : > { %v3505_v48 = vpop.permute.xlu1 %788  ;;  %v3507_v49 = vpop.permute.xlu0 %724 }
  0xaf   : > { %927 = vrot.lane.b32.xlu1 %v3502_v47, %s3188_s26  ;;  %867 = vrot.lane.b32.xlu0 %v635_v38, %s3187_s25 }
  0xb1   : > { %v1043_v60 = vpop.permute.xlu1 %1042  ;;  %v980_v61 = vpop.permute.xlu0 %979 }
  0xb2   : > { %v1250_v62 = vsel %vm1249_vm10, %v1229_v59, %v1043_v60  ;;  %v1230_v16 = vsel %vm1228_vm9, %v1209_v11, %v980_v61  ;;  %v1148_v60 = vsel %vm1144_vm5, %v1127_v56, %v3507_v49  ;;  %v641_v49 = vrot.slane %v3577_v41, 2 }
  0xb3   : > { %738 = vrot.lane.b32.xlu1 %v3502_v47, %s3183_s21  ;;  %678 = vrot.lane.b32.xlu0 %v635_v38, %s3184_s22  ;;  %v1126_v38 = vsel %vm1123_vm4, %v1105_v37, %v3481_v33 }
  0xb4   : > { %3013 = vmatprep.mubr.msk.f32.mxu0 %vm1275_vm11, %v1250_v62  ;;  %v1147_v42 = vsel %vm1144_vm5, %v1126_v38, %v3490_v39  ;;  %v530_v39 = vrot.slane %v3577_v41, 1 }
  0xb5   : > { %v3533_v5 = vpop.permute.xlu1 %790  ;;  %v3535_v6 = vpop.permute.xlu0 %553  ;;  %v1168_v1 = vsel %vm1165_vm6, %v1147_v42, %v3505_v48  ;;  %v3673_v42 = vld [vmem:[%s3654_s18 + $0x8] sm:$0xff] }
  0xb6   : > { %v532_v59 = vsel %vm494_vm1, %v530_v39, %v531_v51  ;;  %v1169_v34 = vsel %vm1165_vm6, %v1148_v60, %v3533_v5 }
  0xb7   : > { %993 = vrot.lane.b32.xlu1 %v527_v63, %s3189_s13  ;;  %929 = vrot.lane.b32.xlu0 %v3510_v50, %s3188_s26 }
  0xb9   : > { %v1045_v17 = vpop.permute.xlu1 %1044  ;;  %v854_v18 = vpop.permute.xlu0 %853 }
  0xba   : > { %v1251_v19 = vsel %vm1249_vm10, %v1230_v16, %v1045_v17  ;;  %v1189_v21 = vsel %vm1186_vm7, %v1168_v1, %v854_v18  ;;  %v644_v16 = vrot.slane %v451_v0, 2  ;;  %v536_v1 = vrot.slane %v3673_v42, 1 }
  0xbb   : > { %804 = vrot.lane.b32.xlu1 %v527_v63, %s3186_s24  ;;  %740 = vrot.lane.b32.xlu0 %v3510_v50, %s3183_s21 }
  0xbc   : > { %3014 = vmatmul.mubr.msk.f32.vlgmr.msra.gmra.mxu0 %vm1275_vm11, %v1251_v19 }
  0xbd   : > { %v3554_v23 = vpop.permute.xlu1 %664  ;;  %v3556_v24 = vpop.permute.xlu0 %555 }
  0xbe   : > { %v1108_v51 = vsel %vm1102_vm3, %v3333_v27, %v3556_v24  ;;  %v454_v27 = vld [vmem:[%s3654_s18 + $0x10] sm:$0x3] }
  0xbf   : > { %1058 = vrot.lane.b32.xlu1 %v638_v20, %s3190_s17  ;;  %995 = vrot.lane.b32.xlu0 %v529_v22, %s3189_s13  ;;  %v538_v60 = vrot.slane %v454_v27, 1 }
  0xc1   : > { %v916_v28 = vpop.permute.xlu1 %915  ;;  %v856_v29 = vpop.permute.xlu0 %855 }
  0xc2   : > { %v1210_v33 = vsel %vm1207_vm8, %v1189_v21, %v916_v28  ;;  %v1190_v62 = vsel %vm1186_vm7, %v1169_v34, %v856_v29  ;;  %v1107_v29 = vsel %vm1102_vm3, %v3329_v25, %v3535_v6 }
  0xc3   : > { %806 = vrot.lane.b32.xlu1 %v529_v22, %s3186_s24  ;;  %569 = vrot.lane.b32.xlu0 %v527_v63, %s3185_s23  ;;  %v642_v63 = vrot.slane %v3586_v2, 2 }
  0xc5   : > { %v3563_v31 = vpop.permute.xlu1 %726  ;;  %v3565_v32 = vpop.permute.xlu0 %666  ;;  %v643_v11 = vsel %vm605_vm0, %v641_v49, %v642_v63  ;;  %v645_v19 = vsel %vm605_vm0, %v642_v63, %v644_v16  ;;  %v539_v49 = vsel %vm494_vm1, %v536_v1, %v538_v60 }
  0xc7   : > { %1060 = vrot.lane.b32.xlu1 %v640_v30, %s3190_s17  ;;  %869 = vrot.lane.b32.xlu0 %v638_v20, %s3187_s25 }
  0xc9   : > { %v982_v35 = vpop.permute.xlu1 %981  ;;  %v918_v36 = vpop.permute.xlu0 %917 }
  0xca   : > { %v1231_v52 = vsel %vm1228_vm9, %v1210_v33, %v982_v35  ;;  %v1211_v40 = vsel %vm1207_vm8, %v1190_v62, %v918_v36  ;;  %v3664_v35 = vld [vmem:[%s3654_s18] sm:$0xff] }
  0xcb   : > { %680 = vrot.lane.b32.xlu1 %v638_v20, %s3184_s22  ;;  %571 = vrot.lane.b32.xlu0 %v529_v22, %s3185_s23 }
  0xcd   : > { %v3581_v43 = vpop.permute.xlu1 %792  ;;  %v3583_v46 = vpop.permute.xlu0 %728 }
  0xcf   : > { %931 = vrot.lane.b32.xlu1 %v3577_v41, %s3188_s26  ;;  %871 = vrot.lane.b32.xlu0 %v640_v30, %s3187_s25 }
  0xd1   : > { %v1047_v53 = vpop.permute.xlu1 %1046  ;;  %v984_v54 = vpop.permute.xlu0 %983 }
  0xd2   : > { %v1252_v48 = vsel %vm1249_vm10, %v1231_v52, %v1047_v53  ;;  %v1232_v7 = vsel %vm1228_vm9, %v1211_v40, %v984_v54  ;;  %v1129_v52 = vsel %vm1123_vm4, %v1108_v51, %v3565_v32 }
  0xd3   : > { %742 = vrot.lane.b32.xlu1 %v3577_v41, %s3183_s21  ;;  %682 = vrot.lane.b32.xlu0 %v640_v30, %s3184_s22  ;;  %v1128_v30 = vsel %vm1123_vm4, %v1107_v29, %v3554_v23  ;;  %v1150_v54 = vsel %vm1144_vm5, %v1129_v52, %v3583_v46  ;;  %v647_v46 = vrot.slane %v3673_v42, 2 }
  0xd4   : > { %3016 = vmatprep.mubr.msk.f32.mxu0 %vm1275_vm11, %v1252_v48  ;;  %v1149_v36 = vsel %vm1144_vm5, %v1128_v30, %v3563_v31  ;;  %v535_v31 = vrot.slane %v3664_v35, 1 }
  0xd5   : > { %v3612_v61 = vpop.permute.xlu1 %794  ;;  %v3614_v3 = vpop.permute.xlu0 %557  ;;  %v1170_v25 = vsel %vm1165_vm6, %v1149_v36, %v3581_v43 }
  0xd6   : > { %v537_v53 = vsel %vm494_vm1, %v535_v31, %v536_v1  ;;  %v1171_v24 = vsel %vm1165_vm6, %v1150_v54, %v3612_v61 }
  0xd7   : > { %997 = vrot.lane.b32.xlu1 %v532_v59, %s3189_s13  ;;  %933 = vrot.lane.b32.xlu0 %v3586_v2, %s3188_s26 }
  0xd9   : > { %v1049_v8 = vpop.permute.xlu1 %1048  ;;  %v858_v9 = vpop.permute.xlu0 %857 }
  0xda   : > { %v1253_v5 = vsel %vm1249_vm10, %v1232_v7, %v1049_v8  ;;  %v1191_v6 = vsel %vm1186_vm7, %v1170_v25, %v858_v9  ;;  %v649_v7 = vrot.slane %v454_v27, 2  ;;  %v3786_v25 = vld [vmem:[%s3654_s18 + $0x20] sm:$0xff] }
  0xdb   : > { %808 = vrot.lane.b32.xlu1 %v532_v59, %s3186_s24  ;;  %744 = vrot.lane.b32.xlu0 %v3586_v2, %s3183_s21  ;;  %v652_v54 = vrot.slane %v3786_v25, 2 }
  0xdc   : > { %3017 = vmatmul.mubr.msk.f32.gmra.mxu0 %vm1275_vm11, %v1253_v5  ;;  %v3191_v5 = vmov 0.0  }
  0xdd   : > { %v3634_v10 = vpop.permute.xlu1 %668  ;;  %v3636_v14 = vpop.permute.xlu0 %559  ;;  %1642 = vst.msk [vmem:[#allocation2 + $0x8] sm:$0xff] %vm1123_vm4, %v3191_v5  ;;  %1641 = vst.msk [vmem:[#allocation2] sm:$0xff] %vm1123_vm4, %v3191_v5 }
  0xde   : > { %1644 = vst.msk [vmem:[#allocation2 + $0x10] sm:$0x3] %vm1643_vm12, %v3191_v5  ;;  %1647 = vst.msk [vmem:[#allocation2 + $0x28] sm:$0x3] %vm1643_vm12, %v3191_v5 }
  0xdf   : > { %1062 = vrot.lane.b32.xlu1 %v643_v11, %s3190_s17  ;;  %999 = vrot.lane.b32.xlu0 %v534_v13, %s3189_s13  ;;  %1645 = vst.msk [vmem:[#allocation2 + $0x18] sm:$0xff] %vm1123_vm4, %v3191_v5  ;;  %1646 = vst.msk [vmem:[#allocation2 + $0x20] sm:$0xff] %vm1123_vm4, %v3191_v5 }
  0xe0   : > { %1648 = vst.msk [vmem:[#allocation2 + $0x30] sm:$0xff] %vm1123_vm4, %v3191_v5  ;;  %1649 = vst.msk [vmem:[#allocation2 + $0x38] sm:$0xff] %vm1123_vm4, %v3191_v5 }
  0xe1   : > { %v920_v17 = vpop.permute.xlu1 %919  ;;  %v860_v18 = vpop.permute.xlu0 %859  ;;  %1650 = vst.msk [vmem:[#allocation2 + $0x40] sm:$0x3] %vm1643_vm12, %v3191_v5  ;;  %1653 = vst.msk [vmem:[#allocation2 + $0x58] sm:$0x3] %vm1643_vm12, %v3191_v5 }
  0xe2   : > { %v1212_v23 = vsel %vm1207_vm8, %v1191_v6, %v920_v17  ;;  %v1192_v56 = vsel %vm1186_vm7, %v1171_v24, %v860_v18  ;;  %1651 = vst.msk [vmem:[#allocation2 + $0x48] sm:$0xff] %vm1123_vm4, %v3191_v5  ;;  %1652 = vst.msk [vmem:[#allocation2 + $0x50] sm:$0xff] %vm1123_vm4, %v3191_v5  ;;  %v541_v6 = vrot.slane %v3786_v25, 1 }
  0xe3   : > { %810 = vrot.lane.b32.xlu1 %v534_v13, %s3186_s24  ;;  %573 = vrot.lane.b32.xlu0 %v532_v59, %s3185_s23  ;;  %v646_v59 = vrot.slane %v3664_v35, 2  ;;  %1654 = vst.msk [vmem:[#allocation2 + $0x60] sm:$0xff] %vm1123_vm4, %v3191_v5  ;;  %1655 = vst.msk [vmem:[#allocation2 + $0x68] sm:$0xff] %vm1123_vm4, %v3191_v5 }
  0xe4   : > { %1656 = vst.msk [vmem:[#allocation2 + $0x70] sm:$0x3] %vm1643_vm12, %v3191_v5  ;;  %1659 = vst.msk [vmem:[#allocation2 + $0x88] sm:$0x3] %vm1643_vm12, %v3191_v5 }
  0xe5   : > { %v3645_v20 = vpop.permute.xlu1 %730  ;;  %v3647_v22 = vpop.permute.xlu0 %670  ;;  %v648_v40 = vsel %vm605_vm0, %v646_v59, %v647_v46  ;;  %1657 = vst.msk [vmem:[#allocation2 + $0x78] sm:$0xff] %vm1123_vm4, %v3191_v5  ;;  %1658 = vst.msk [vmem:[#allocation2 + $0x80] sm:$0xff] %vm1123_vm4, %v3191_v5 }
  0xe6   : > { %1660 = vst.msk [vmem:[#allocation2 + $0x90] sm:$0xff] %vm1123_vm4, %v3191_v5  ;;  %1661 = vst.msk [vmem:[#allocation2 + $0x98] sm:$0xff] %vm1123_vm4, %v3191_v5 }
  0xe7   : > { %1064 = vrot.lane.b32.xlu1 %v645_v19, %s3190_s17  ;;  %873 = vrot.lane.b32.xlu0 %v643_v11, %s3187_s25  ;;  %1662 = vst.msk [vmem:[#allocation2 + $0xa0] sm:$0x3] %vm1643_vm12, %v3191_v5  ;;  %1665 = vst.msk [vmem:[#allocation2 + $0xb8] sm:$0x3] %vm1643_vm12, %v3191_v5 }
  0xe8   : > { %1663 = vst.msk [vmem:[#allocation2 + $0xa8] sm:$0xff] %vm1123_vm4, %v3191_v5  ;;  %1664 = vst.msk [vmem:[#allocation2 + $0xb0] sm:$0xff] %vm1123_vm4, %v3191_v5 }
  0xe9   : > { %v986_v26 = vpop.permute.xlu1 %985  ;;  %v922_v28 = vpop.permute.xlu0 %921  ;;  %1666 = vst.msk [vmem:[#allocation2 + $0xc0] sm:$0xff] %vm1123_vm4, %v3191_v5  ;;  %1667 = vst.msk [vmem:[#allocation2 + $0xc8] sm:$0xff] %vm1123_vm4, %v3191_v5 }
  0xea   : > { %v1233_v21 = vsel %vm1228_vm9, %v1212_v23, %v986_v26  ;;  %v1213_v32 = vsel %vm1207_vm8, %v1192_v56, %v922_v28  ;;  %1668 = vst.msk [vmem:[#allocation2 + $0xd0] sm:$0x3] %vm1643_vm12, %v3191_v5  ;;  %1671 = vst.msk [vmem:[#allocation2 + $0xe8] sm:$0x3] %vm1643_vm12, %v3191_v5  ;;  %v3777_v28 = vld [vmem:[%s3654_s18 + $0x18] sm:$0xff] }
  0xeb   : > { %684 = vrot.lane.b32.xlu1 %v643_v11, %s3184_s22  ;;  %575 = vrot.lane.b32.xlu0 %v534_v13, %s3185_s23  ;;  %1669 = vst.msk [vmem:[#allocation2 + $0xd8] sm:$0xff] %vm1123_vm4, %v3191_v5  ;;  %1670 = vst.msk [vmem:[#allocation2 + $0xe0] sm:$0xff] %vm1123_vm4, %v3191_v5  ;;  %v650_v11 = vsel %vm605_vm0, %v647_v46, %v649_v7 }
  0xed   : > { %v3668_v37 = vpop.permute.xlu1 %796  ;;  %v3670_v38 = vpop.permute.xlu0 %732 }
  0xef   : > { %935 = vrot.lane.b32.xlu1 %v3664_v35, %s3188_s26  ;;  %875 = vrot.lane.b32.xlu0 %v645_v19, %s3187_s25 }
  0xf1   : > { %v1051_v33 = vpop.permute.xlu1 %1050  ;;  %v988_v39 = vpop.permute.xlu0 %987 }
  0xf2   : > { %v1254_v43 = vsel %vm1249_vm10, %v1233_v21, %v1051_v33  ;;  %v1234_v0 = vsel %vm1228_vm9, %v1213_v32, %v988_v39  ;;  %v1110_v21 = vsel %vm1102_vm3, %v3383_v45, %v3636_v14  ;;  %v457_v45 = vld [vmem:[%s3654_s18 + $0x28] sm:$0x3] }
  0xf3   : > { %746 = vrot.lane.b32.xlu1 %v3664_v35, %s3183_s21  ;;  %686 = vrot.lane.b32.xlu0 %v645_v19, %s3184_s22  ;;  %v1109_v19 = vsel %vm1102_vm3, %v3380_v44, %v3614_v3  ;;  %v1131_v33 = vsel %vm1123_vm4, %v1110_v21, %v3647_v22  ;;  %v543_v27 = vrot.slane %v457_v45, 1 }
  0xf4   : > { %3019 = vmatprep.mubr.msk.f32.mxu0 %vm1275_vm11, %v1254_v43  ;;  %v1130_v26 = vsel %vm1123_vm4, %v1109_v19, %v3634_v10  ;;  %v1152_v43 = vsel %vm1144_vm5, %v1131_v33, %v3670_v38  ;;  %v651_v38 = vrot.slane %v3777_v28, 2  ;;  %v460_v33 = vld [vmem:[%s3654_s18 + $0x40] sm:$0x3] }
  0xf5   : > { %v3698_v48 = vpop.permute.xlu1 %798  ;;  %v3700_v55 = vpop.permute.xlu0 %561  ;;  %v1151_v29 = vsel %vm1144_vm5, %v1130_v26, %v3645_v20  ;;  %v540_v20 = vrot.slane %v3777_v28, 1  ;;  %v544_v46 = vsel %vm494_vm1, %v541_v6, %v543_v27 }
  0xf6   : > { %v1172_v44 = vsel %vm1165_vm6, %v1151_v29, %v3668_v37  ;;  %v1173_v14 = vsel %vm1165_vm6, %v1152_v43, %v3698_v48  ;;  %v653_v59 = vsel %vm605_vm0, %v651_v38, %v652_v54  ;;  %v1111_v5 = vsel %vm1102_vm3, %v3415_v57, %v3700_v55  ;;  %v459_v29 = vld [vmem:[%s3654_s18 + $0x38] sm:$0xff] }
  0xf7   : > { %1001 = vrot.lane.b32.xlu1 %v537_v53, %s3189_s13  ;;  %937 = vrot.lane.b32.xlu0 %v3673_v42, %s3188_s26  ;;  %v542_v39 = vsel %vm494_vm1, %v540_v20, %v541_v6  ;;  %v845_v43 = vrot.slane %v459_v29, 2 }
  0xf9   : > { %v1053_v34 = vpop.permute.xlu1 %1052  ;;  %v3713_v62 = vpop.permute.xlu0 %861 }
  0xfa   : > { %v1255_v61 = vsel %vm1249_vm10, %v1234_v0, %v1053_v34  ;;  %v1193_v3 = vsel %vm1186_vm7, %v1172_v44, %v3713_v62  ;;  %v654_v34 = vrot.slane %v457_v45, 2  ;;  %v782_v45 = vrot.slane %v460_v33, 1 }
  0xfb   : > { %812 = vrot.lane.b32.xlu1 %v537_v53, %s3186_s24  ;;  %748 = vrot.lane.b32.xlu0 %v3673_v42, %s3183_s21 }
  0xfc   : > { %3020 = vmatmul.mubr.msk.f32.gmra.mxu0 %vm1275_vm11, %v1255_v61 }
  0xfd   : > { %v3722_v63 = vpop.permute.xlu1 %672  ;;  %v3724_v4 = vpop.permute.xlu0 %563 }
  0xff   : > { %1066 = vrot.lane.b32.xlu1 %v648_v40, %s3190_s17  ;;  %1003 = vrot.lane.b32.xlu0 %v539_v49, %s3189_s13 }
 0x101   : > { %v924_v8 = vpop.permute.xlu1 %923  ;;  %v3728_v9 = vpop.permute.xlu0 %863 }
 0x102   : > { %v1214_v10 = vsel %vm1207_vm8, %v1193_v3, %v924_v8  ;;  %v780_v3 = vrot.slane %v459_v29, 1 }
 0x103   : > { %814 = vrot.lane.b32.xlu1 %v539_v49, %s3186_s24  ;;  %577 = vrot.lane.b32.xlu0 %v537_v53, %s3185_s23  ;;  %v1194_v53 = vsel %vm1186_vm7, %v1173_v14, %v3728_v9 }
 0x104   : > { %v783_v38 = vsel %vm494_vm1, %v780_v3, %v782_v45 }
 0x105   : > { %v3763_v13 = vpop.permute.xlu1 %734  ;;  %v3765_v16 = vpop.permute.xlu0 %674 }
 0x107   : > { %1068 = vrot.lane.b32.xlu1 %v650_v11, %s3190_s17  ;;  %877 = vrot.lane.b32.xlu0 %v648_v40, %s3187_s25 }
 0x109   : > { %v990_v17 = vpop.permute.xlu1 %989  ;;  %v926_v18 = vpop.permute.xlu0 %925 }
 0x10a   : > { %v1235_v23 = vsel %vm1228_vm9, %v1214_v10, %v990_v17  ;;  %v1215_v22 = vsel %vm1207_vm8, %v1194_v53, %v926_v18  ;;  %v458_v17 = vld [vmem:[%s3654_s18 + $0x30] sm:$0xff] }
 0x10b   : > { %688 = vrot.lane.b32.xlu1 %v648_v40, %s3184_s22  ;;  %579 = vrot.lane.b32.xlu0 %v539_v49, %s3185_s23  ;;  %v655_v40 = vsel %vm605_vm0, %v652_v54, %v654_v34  ;;  %v462_v34 = vld [vmem:[%s3654_s18 + $0x50] sm:$0xff] }
 0x10d   : > { %v3781_v30 = vpop.permute.xlu1 %800  ;;  %v3783_v36 = vpop.permute.xlu0 %736 }
 0x10f   : > { %939 = vrot.lane.b32.xlu1 %v3777_v28, %s3188_s26  ;;  %879 = vrot.lane.b32.xlu0 %v650_v11, %s3187_s25 }
 0x111   : > { %v1055_v31 = vpop.permute.xlu1 %1054  ;;  %v992_v1 = vpop.permute.xlu0 %991 }
 0x112   : > { %v1256_v37 = vsel %vm1249_vm10, %v1235_v23, %v1055_v31  ;;  %v1236_v24 = vsel %vm1228_vm9, %v1215_v22, %v992_v1 }
 0x113   : > { %750 = vrot.lane.b32.xlu1 %v3777_v28, %s3183_s21  ;;  %690 = vrot.lane.b32.xlu0 %v650_v11, %s3184_s22  ;;  %v1132_v11 = vsel %vm1123_vm4, %v1111_v5, %v3722_v63  ;;  %v779_v63 = vrot.slane %v458_v17, 1 }
 0x114   : > { %3022 = vmatprep.mubr.msk.f32.mxu0 %vm1275_vm11, %v1256_v37  ;;  %v1153_v18 = vsel %vm1144_vm5, %v1132_v11, %v3763_v13 }
 0x115   : > { %v3812_v51 = vpop.permute.xlu1 %802  ;;  %v3814_v52 = vpop.permute.xlu0 %565  ;;  %v1174_v44 = vsel %vm1165_vm6, %v1153_v18, %v3781_v30  ;;  %v1112_v30 = vsel %vm1102_vm3, %v3418_v58, %v3724_v4  ;;  %v781_v31 = vsel %vm494_vm1, %v779_v63, %v780_v3  ;;  %v1038_v18 = vrot.slane %v462_v34, 2 }
 0x116   : > { %v1133_v23 = vsel %vm1123_vm4, %v1112_v30, %v3765_v16 }
 0x117   : > { %1005 = vrot.lane.b32.xlu1 %v542_v39, %s3189_s13  ;;  %941 = vrot.lane.b32.xlu0 %v3786_v25, %s3188_s26  ;;  %v1154_v1 = vsel %vm1144_vm5, %v1133_v23, %v3783_v36 }
 0x118   : > { %v1175_v58 = vsel %vm1165_vm6, %v1154_v1, %v3812_v51 }
 0x119   : > { %v1057_v56 = vpop.permute.xlu1 %1056  ;;  %v866_v32 = vpop.permute.xlu0 %865 }
 0x11a   : > { %v1257_v48 = vsel %vm1249_vm10, %v1236_v24, %v1057_v56  ;;  %v1195_v57 = vsel %vm1186_vm7, %v1174_v44, %v866_v32  ;;  %v847_v24 = vrot.slane %v460_v33, 2 }
 0x11b   : > { %816 = vrot.lane.b32.xlu1 %v542_v39, %s3186_s24  ;;  %752 = vrot.lane.b32.xlu0 %v3786_v25, %s3183_s21 }
 0x11c   : > { %3023 = vmatmul.mubr.msk.f32.gmra.mxu0 %vm1275_vm11, %v1257_v48  ;;  %v848_v48 = vsel %vm605_vm0, %v845_v43, %v847_v24 }
 0x11d   : > { %v3835_v60 = vpop.permute.xlu1 %676  ;;  %v3837_v0 = vpop.permute.xlu0 %567 }
 0x11f   : > { %1070 = vrot.lane.b32.xlu1 %v653_v59, %s3190_s17  ;;  %1007 = vrot.lane.b32.xlu0 %v544_v46, %s3189_s13 }
 0x121   : > { %v928_v62 = vpop.permute.xlu1 %927  ;;  %v868_v61 = vpop.permute.xlu0 %867 }
 0x122   : > { %v1216_v55 = vsel %vm1207_vm8, %v1195_v57, %v928_v62  ;;  %v1196_v4 = vsel %vm1186_vm7, %v1175_v58, %v868_v61  ;;  %v461_v62 = vld [vmem:[%s3654_s18 + $0x48] sm:$0xff]  ;;  %v463_v61 = vld [vmem:[%s3654_s18 + $0x58] sm:$0x3] }
 0x123   : > { %818 = vrot.lane.b32.xlu1 %v544_v46, %s3186_s24  ;;  %581 = vrot.lane.b32.xlu0 %v542_v39, %s3185_s23  ;;  %v844_v39 = vrot.slane %v458_v17, 2  ;;  %v1040_v63 = vrot.slane %v463_v61, 2 }
 0x125   : > { %v3844_v49 = vpop.permute.xlu1 %738  ;;  %v3846_v7 = vpop.permute.xlu0 %678  ;;  %v846_v51 = vsel %vm605_vm0, %v844_v39, %v845_v43 }
 0x127   : > { %1072 = vrot.lane.b32.xlu1 %v655_v40, %s3190_s17  ;;  %881 = vrot.lane.b32.xlu0 %v653_v59, %s3187_s25 }
 0x129   : > { %v994_v8 = vpop.permute.xlu1 %993  ;;  %v930_v9 = vpop.permute.xlu0 %929 }
 0x12a   : > { %v1237_v13 = vsel %vm1228_vm9, %v1216_v55, %v994_v8  ;;  %v1217_v16 = vsel %vm1207_vm8, %v1196_v4, %v930_v9  ;;  %v972_v8 = vrot.slane %v461_v62, 1  ;;  %v975_v9 = vrot.slane %v463_v61, 1 }
 0x12b   : > { %692 = vrot.lane.b32.xlu1 %v653_v59, %s3184_s22  ;;  %583 = vrot.lane.b32.xlu0 %v544_v46, %s3185_s23 }
 0x12d   : > { %v3860_v19 = vpop.permute.xlu1 %804  ;;  %v3862_v26 = vpop.permute.xlu0 %740 }
 0x12f   : > { %943 = vrot.lane.b32.xlu1 %v458_v17, %s3188_s26  ;;  %883 = vrot.lane.b32.xlu0 %v655_v40, %s3187_s25 }
 0x131   : > { %v1059_v10 = vpop.permute.xlu1 %1058  ;;  %v996_v20 = vpop.permute.xlu0 %995 }
 0x132   : > { %v1258_v6 = vsel %vm1249_vm10, %v1237_v13, %v1059_v10  ;;  %v1238_v36 = vsel %vm1228_vm9, %v1217_v16, %v996_v20  ;;  %v1041_v20 = vsel %vm605_vm0, %v1038_v18, %v1040_v63  ;;  %v3999_v63 = vstv %s2923_s14  ;;  %s3194_s14 = smov 56  }
 0x133   : > { %754 = vrot.lane.b32.xlu1 %v458_v17, %s3183_s21  ;;  %694 = vrot.lane.b32.xlu0 %v655_v40, %s3184_s22  ;;  %v973_v40 = vrot.slane %v462_v34, 1  ;;  %v1113_v17 = vsel %vm1102_vm3, %v3452_v12, %v3814_v52  ;;  %vm1591_vm13 = vcmp.ge.s32.totalorder %v3999_v63, 0  ;;  %vm1601_vm14 = vcmp.lt.s32.totalorder %v3999_v63, 16 }
 0x134   : > { %3025 = vmatprep.mubr.msk.f32.mxu0 %vm1275_vm11, %v1258_v6  ;;  %v1134_v44 = vsel %vm1123_vm4, %v1113_v17, %v3835_v60  ;;  %vm1611_vm15 = vmand %vm1591_vm13, %vm1601_vm14 }
 0x135   : > { %v3884_v37 = vpop.permute.xlu1 %806  ;;  %v3886_v21 = vpop.permute.xlu0 %569  ;;  %v976_v57 = vsel %vm494_vm1, %v973_v40, %v975_v9  ;;  %v974_v55 = vsel %vm494_vm1, %v972_v8, %v973_v40  ;;  %v1155_v3 = vsel %vm1144_vm5, %v1134_v44, %v3844_v49 }
 0x136   : > { %v1176_v12 = vsel %vm1165_vm6, %v1155_v3, %v3860_v19  ;;  %v1114_v19 = vsel %vm1102_vm3, %v3455_v15, %v3837_v0  ;;  %v1115_v24 = vsel %vm1102_vm3, %v3502_v47, %v3886_v21 }
 0x137   : > { %1009 = vrot.lane.b32.xlu1 %v781_v31, %s3189_s13  ;;  %945 = vrot.lane.b32.xlu0 %v459_v29, %s3188_s26  ;;  %v1135_v1 = vsel %vm1123_vm4, %v1114_v19, %v3846_v7 }
 0x138   : > { %v1156_v33 = vsel %vm1144_vm5, %v1135_v1, %v3862_v26 }
 0x139   : > { %v1061_v14 = vpop.permute.xlu1 %1060  ;;  %v870_v53 = vpop.permute.xlu0 %869  ;;  %v1177_v16 = vsel %vm1165_vm6, %v1156_v33, %v3884_v37 }
 0x13a   : > { %v1259_v22 = vsel %vm1249_vm10, %v1238_v36, %v1061_v14  ;;  %v1197_v52 = vsel %vm1186_vm7, %v1176_v12, %v870_v53 }
 0x13b   : > { %820 = vrot.lane.b32.xlu1 %v781_v31, %s3186_s24  ;;  %756 = vrot.lane.b32.xlu0 %v459_v29, %s3183_s21  ;;  %v1037_v29 = vrot.slane %v461_v62, 2  ;;  %s3193_s21 = smov 48  }
 0x13c   : > { %3026 = vmatmul.mubr.msk.f32.gmra.mxu0 %vm1275_vm11, %v1259_v22 }
 0x13d   : > { %v3902_v54 = vpop.permute.xlu1 %680  ;;  %v3904_v27 = vpop.permute.xlu0 %571  ;;  %v1039_v6 = vsel %vm605_vm0, %v1037_v29, %v1038_v18 }
 0x13e   : > { %v1116_v21 = vsel %vm1102_vm3, %v3510_v50, %v3904_v27 }
 0x13f   : > { %1074 = vrot.lane.b32.xlu1 %v846_v51, %s3190_s17  ;;  %1011 = vrot.lane.b32.xlu0 %v783_v38, %s3189_s13 }
 0x141   : > { %v932_v56 = vpop.permute.xlu1 %931  ;;  %v872_v32 = vpop.permute.xlu0 %871 }
 0x142   : > { %v1218_v60 = vsel %vm1207_vm8, %v1197_v52, %v932_v56  ;;  %v1198_v15 = vsel %vm1186_vm7, %v1177_v16, %v872_v32  ;;  %v1136_v56 = vsel %vm1123_vm4, %v1115_v24, %v3902_v54 }
 0x143   : > { %885 = vrot.lane.b32.xlu1 %v846_v51, %s3187_s25  ;;  %822 = vrot.lane.b32.xlu0 %v783_v38, %s3186_s24 }
 0x145   : > { %v743_v59 = vpop.permute.xlu1 %742  ;;  %v3911_v46 = vpop.permute.xlu0 %682 }
 0x146   : > { %v1157_v32 = vsel %vm1144_vm5, %v1136_v56, %v743_v59  ;;  %v1137_v54 = vsel %vm1123_vm4, %v1116_v21, %v3911_v46  ;;  %v3997_v46 = vld [vmem:[%s4782_s3] ss:$0 sm:$0xff] }
 0x147   : > { %887 = vrot.lane.b32.xlu1 %v848_v48, %s3187_s25  ;;  %1076 = vrot.lane.b32.xlu0 %v848_v48, %s3190_s17 }
 0x149   : > { %v998_v5 = vpop.permute.xlu1 %997  ;;  %v934_v11 = vpop.permute.xlu0 %933 }
 0x14a   : > { %v1239_v30 = vsel %vm1228_vm9, %v1218_v60, %v998_v5  ;;  %v1219_v0 = vsel %vm1207_vm8, %v1198_v15, %v934_v11 }
 0x14b   : > { %949 = vrot.lane.b32.xlu1 %v462_v34, %s3188_s26  ;;  %947 = vrot.lane.b32.xlu0 %v461_v62, %s3188_s26 }
 0x14d   : > { %v809_v13 = vpop.permute.xlu1 %808  ;;  %v745_v10 = vpop.permute.xlu0 %744 }
 0x14e   : > { %v1178_v62 = vsel %vm1165_vm6, %v1157_v32, %v809_v13  ;;  %v1158_v59 = vsel %vm1144_vm5, %v1137_v54, %v745_v10  ;;  %v4005_v13 = vld [vmem:[%s4783_s4] ss:$0 sm:$0xff] }
 0x14f   : > { %1015 = vrot.lane.b32.xlu1 %v976_v57, %s3189_s13  ;;  %1013 = vrot.lane.b32.xlu0 %v974_v55, %s3189_s13 }
 0x151   : > { %v1063_v49 = vpop.permute.xlu1 %1062  ;;  %v1000_v23 = vpop.permute.xlu0 %999 }
 0x152   : > { %v1260_v31 = vsel %vm1249_vm10, %v1239_v30, %v1063_v49  ;;  %v1240_v39 = vsel %vm1228_vm9, %v1219_v0, %v1000_v23 }
 0x153   : > { %1080 = vrot.lane.b32.xlu1 %v1041_v20, %s3190_s17  ;;  %1078 = vrot.lane.b32.xlu0 %v1039_v6, %s3190_s17 }
 0x154   : > { %3028 = vmatprep.mubr.msk.f32.mxu0 %vm1275_vm11, %v1260_v31 }
 0x155   : > { %v811_v58 = vpop.permute.xlu1 %810  ;;  %v3949_v4 = vpop.permute.xlu0 %573 }
 0x156   : > { %v1179_v18 = vsel %vm1165_vm6, %v1158_v59, %v811_v58 }
 0x159   : > { %v1065_v43 = vpop.permute.xlu1 %1064  ;;  %v874_v45 = vpop.permute.xlu0 %873 }
 0x15a   : > { %v1261_v7 = vsel %vm1249_vm10, %v1240_v39, %v1065_v43  ;;  %v1199_v61 = vsel %vm1186_vm7, %v1178_v62, %v874_v45  ;;  %v1117_v39 = vsel %vm1102_vm3, %v3577_v41, %v3949_v4 }
 0x15b   : > { %3029 = vmatmul.mubr.msk.f32.gmra.mxu0 %vm1275_vm11, %v1261_v7 }
 0x15d   : > { %v3958_v36 = vpop.permute.xlu1 %684  ;;  %v3960_v26 = vpop.permute.xlu0 %575 }
 0x15e   : > { %v1138_v45 = vsel %vm1123_vm4, %v1117_v39, %v3958_v36 }
 0x161   : > { %v936_v14 = vpop.permute.xlu1 %935  ;;  %v876_v53 = vpop.permute.xlu0 %875 }
 0x162   : > { %v1220_v40 = vsel %vm1207_vm8, %v1199_v61, %v936_v14  ;;  %v1200_v29 = vsel %vm1186_vm7, %v1179_v18, %v876_v53 }
 0x165   : > { %v747_v22 = vpop.permute.xlu1 %746  ;;  %v3962_v37 = vpop.permute.xlu0 %686 }
 0x166   : > { %v1159_v7 = vsel %vm1144_vm5, %v1138_v45, %v747_v22 }
 0x169   : > { %v1002_v51 = vpop.permute.xlu1 %1001  ;;  %v938_v38 = vpop.permute.xlu0 %937 }
 0x16a   : > { %v1241_v8 = vsel %vm1228_vm9, %v1220_v40, %v1002_v51  ;;  %v1221_v44 = vsel %vm1207_vm8, %v1200_v29, %v938_v38 }
 0x16d   : > { %v813_v48 = vpop.permute.xlu1 %812  ;;  %v3970_v34 = vpop.permute.xlu0 %748 }
 0x16e   : > { %v1180_v38 = vsel %vm1165_vm6, %v1159_v7, %v813_v48  ;;  %v1118_v48 = vsel %vm1102_vm3, %v3586_v2, %v3960_v26 }
 0x16f   : > { %v1139_v61 = vsel %vm1123_vm4, %v1118_v48, %v3962_v37  ;;  %v1582_v37 = vadd.s32 1, %v3999_v63 }
 0x170   : > { %v1160_v40 = vsel %vm1144_vm5, %v1139_v61, %v3970_v34 }
 0x171   : > { %v1067_v9 = vpop.permute.xlu1 %1066  ;;  %v1004_v5 = vpop.permute.xlu0 %1003  ;;  %vm1592_vm0 = vcmp.ge.s32.totalorder %v1582_v37, 0  ;;  %vm1602_vm1 = vcmp.lt.s32.totalorder %v1582_v37, 16 }
 0x172   : > { %v1262_v47 = vsel %vm1249_vm10, %v1241_v8, %v1067_v9  ;;  %v1242_v50 = vsel %vm1228_vm9, %v1221_v44, %v1004_v5  ;;  %vm1612_vm2 = vmand %vm1592_vm0, %vm1602_vm1 }
 0x173   : > { %3031 = vmatprep.mubr.msk.f32.mxu0 %vm1275_vm11, %v1262_v47 }
 0x175   : > { %v3984_v11 = vpop.permute.xlu1 %814  ;;  %v3986_v17 = vpop.permute.xlu0 %577 }
 0x176   : > { %v1181_v5 = vsel %vm1165_vm6, %v1160_v40, %v3984_v11 }
 0x179   : > { %v1069_v27 = vpop.permute.xlu1 %1068  ;;  %v878_v57 = vpop.permute.xlu0 %877 }
 0x17a   : > { %v1263_v55 = vsel %vm1249_vm10, %v1242_v50, %v1069_v27  ;;  %v1201_v24 = vsel %vm1186_vm7, %v1180_v38, %v878_v57 }
 0x17b   : > { %3032 = vmatmul.mubr.msk.f32.gmra.mxu0 %vm1275_vm11, %v1263_v55 }
 0x17c   : > { %v3015_v3 = vpop.f32.mrf.mxu0 }
 0x17d   : > { %v1513_v10 = vmul.f32 %v3015_v3, %v3997_v46  ;;  %v4010_v12 = vpop.permute.xlu1 %688  ;;  %v4012_v52 = vpop.permute.xlu0 %579 }
 0x17e   : > { %v1406_v60 = vpop.f32.mrf.mxu0 }
 0x17f   : > { %v1540_v20 = vadd.f32 %v4005_v13, %v1513_v10  ;;  %v1512_v6 = vmul.f32 %v3997_v46, %v1406_v60 }
 0x181   : > { %v1560_v30 = vmax.f32 %v1540_v20, 0.0  ;;  %v1539_v49 = vadd.f32 %v4005_v13, %v1512_v6  ;;  %v940_v23 = vpop.permute.xlu1 %939  ;;  %v880_v31 = vpop.permute.xlu0 %879 }
 0x182   : > { %v1222_v41 = vsel %vm1207_vm8, %v1201_v24, %v940_v23  ;;  %v1202_v47 = vsel %vm1186_vm7, %v1181_v5, %v880_v31 }
 0x183   : > { %v1622_v19 = vsel %vm1611_vm15, %v1560_v30, 0.0  ;;  %v1559_v1 = vmax.f32 %v1539_v49, 0.0 }
 0x184   : > { %1673 = vst.msk [vmem:[#allocation2 + $0x9] sm:$0xff] %vm1123_vm4, %v1622_v19  ;;  %v1119_v19 = vsel %vm1102_vm3, %v3664_v35, %v3986_v17 }
 0x185   : > { %v1621_v33 = vsel %vm1611_vm15, %v1559_v1, 0.0  ;;  %v4018_v58 = vpop.permute.xlu1 %750  ;;  %v4020_v16 = vpop.permute.xlu0 %690 }
 0x186   : > { %1672 = vst.msk [vmem:[#allocation2 + $0x1] sm:$0xff] %vm1123_vm4, %v1621_v33  ;;  %v1140_v33 = vsel %vm1123_vm4, %v1119_v19, %v4010_v12 }
 0x189   : > { %v1006_v15 = vpop.permute.xlu1 %1005  ;;  %v942_v0 = vpop.permute.xlu0 %941 }
 0x18a   : > { %v1243_v4 = vsel %vm1228_vm9, %v1222_v41, %v1006_v15  ;;  %v1223_v21 = vsel %vm1207_vm8, %v1202_v47, %v942_v0  ;;  %v1161_v15 = vsel %vm1144_vm5, %v1140_v33, %v4018_v58 }
 0x18b   : > { %v1709_v43 = vld [vmem:[#allocation2 + $0x9] sm:$0xff] }
 0x18c   : > { %1856 = vrot.lane.b32.xlu1 %v1709_v43, %s3184_s22  ;;  %v1725_v56 = vld [vmem:[#allocation2 + $0xa] sm:$0xff] }
 0x18d   : > { %v817_v14 = vpop.permute.xlu1 %816  ;;  %v1708_v53 = vld [vmem:[#allocation2 + $0x1] sm:$0xff]  ;;  %v4030_v51 = vpop.permute.xlu0 %752 }
 0x18e   : > { %1854 = vrot.lane.b32.xlu0 %v1708_v53, %s3184_s22  ;;  %v1724_v32 = vld [vmem:[#allocation2 + $0x2] sm:$0xff]  ;;  %v1182_v45 = vsel %vm1165_vm6, %v1161_v15, %v817_v14  ;;  %v1120_v14 = vsel %vm1102_vm3, %v3673_v42, %v4012_v52 }
 0x18f   : > { %v2490_v15 = vld [vmem:[%s4784_s5 + $0x40] sm:$0xff] }
 0x190   : > { %1920 = vrot.lane.b32.xlu1 %v1725_v56, %s3186_s24  ;;  %v1141_v56 = vsel %vm1123_vm4, %v1120_v14, %v4020_v16  ;;  %3043 = vmatprep.subr.mxu1 %v2490_v15  ;;  %v2483_v14 = vld [vmem:[%s4784_s5 + $0x8] sm:$0xff] }
 0x191   : > { %v1071_v36 = vpop.permute.xlu1 %1070  ;;  %v1008_v22 = vpop.permute.xlu0 %1007  ;;  %v1162_v41 = vsel %vm1144_vm5, %v1141_v56, %v4030_v51  ;;  %v1583_v51 = vadd.s32 2, %v3999_v63  ;;  %3044 = vmatpush3.msra.mxu1 %v2490_v15  ;;  %v2482_v56 = vld [vmem:[%s4784_s5] sm:$0xff] }
 0x192   : > { %v1264_v62 = vsel %vm1249_vm10, %v1243_v4, %v1071_v36  ;;  %1918 = vrot.lane.b32.xlu0 %v1724_v32, %s3186_s24  ;;  %v1244_v2 = vsel %vm1228_vm9, %v1223_v21, %v1008_v22 }
 0x193   : > { %3034 = vmatprep.mubr.msk.f32.mxu0 %vm1275_vm11, %v1264_v62  ;;  %vm1593_vm12 = vcmp.ge.s32.totalorder %v1583_v51, 0  ;;  %vm1603_vm13 = vcmp.lt.s32.totalorder %v1583_v51, 16 }
 0x194   : > { %vm4127_vm14 = vmand %vm1593_vm12, %vm1603_vm13 }
 0x195   : > { %v4048_v8 = vpop.permute.xlu1 %818  ;;  %v4050_v9 = vpop.permute.xlu0 %581 }
 0x196   : > { %v1183_v22 = vsel %vm1165_vm6, %v1162_v41, %v4048_v8 }
 0x199   : > { %v1073_v26 = vpop.permute.xlu1 %1072  ;;  %v882_v54 = vpop.permute.xlu0 %881 }
 0x19a   : > { %v1265_v59 = vsel %vm1249_vm10, %v1244_v2, %v1073_v26  ;;  %v1203_v35 = vsel %vm1186_vm7, %v1182_v45, %v882_v54  ;;  %v1121_v26 = vsel %vm1102_vm3, %v3777_v28, %v4050_v9 }
 0x19b   : > { %3035 = vmatmul.mubr.msk.f32.gmra.mxu0 %vm1275_vm11, %v1265_v59 }
 0x19c   : > { %v3018_v34 = vpop.f32.mrf.mxu0 }
 0x19d   : > { %v1515_v18 = vmul.f32 %v3018_v34, %v3997_v46  ;;  %v4061_v11 = vpop.permute.xlu1 %692  ;;  %v4063_v29 = vpop.permute.xlu0 %583 }
 0x19e   : > { %v1416_v44 = vpop.f32.mrf.mxu0  ;;  %v1122_v54 = vsel %vm1102_vm3, %v3786_v25, %v4063_v29  ;;  %v1142_v34 = vsel %vm1123_vm4, %v1121_v26, %v4061_v11 }
 0x19f   : > { %v1542_v50 = vadd.f32 %v4005_v13, %v1515_v18  ;;  %v1514_v27 = vmul.f32 %v3997_v46, %v1416_v44 }
 0x1a1   : > { %v1562_v57 = vmax.f32 %v1542_v50, 0.0  ;;  %v1541_v55 = vadd.f32 %v4005_v13, %v1514_v27  ;;  %v944_v3 = vpop.permute.xlu1 %943  ;;  %v884_v10 = vpop.permute.xlu0 %883 }
 0x1a2   : > { %v1224_v17 = vsel %vm1207_vm8, %v1203_v35, %v944_v3  ;;  %v1204_v42 = vsel %vm1186_vm7, %v1183_v22, %v884_v10 }
 0x1a3   : > { %v1624_v60 = vsel %vm1612_vm2, %v1562_v57, 0.0  ;;  %v1561_v20 = vmax.f32 %v1541_v55, 0.0 }
 0x1a4   : > { %1675 = vst.msk [vmem:[#allocation2 + $0x21] sm:$0xff] %vm1123_vm4, %v1624_v60 }
 0x1a5   : > { %v1623_v6 = vsel %vm1612_vm2, %v1561_v20, 0.0  ;;  %v4069_v30 = vpop.permute.xlu1 %754  ;;  %v695_v49 = vpop.permute.xlu0 %694 }
 0x1a6   : > { %1674 = vst.msk [vmem:[#allocation2 + $0x19] sm:$0xff] %vm1123_vm4, %v1623_v6  ;;  %v1143_v18 = vsel %vm1123_vm4, %v1122_v54, %v695_v49  ;;  %v1163_v28 = vsel %vm1144_vm5, %v1142_v34, %v4069_v30 }
 0x1a9   : > { %v1010_v23 = vpop.permute.xlu1 %1009  ;;  %v946_v31 = vpop.permute.xlu0 %945 }
 0x1aa   : > { %v1245_v12 = vsel %vm1228_vm9, %v1224_v17, %v1010_v23  ;;  %v1225_v52 = vsel %vm1207_vm8, %v1204_v42, %v946_v31  ;;  %v2487_v17 = vld [vmem:[%s4784_s5 + $0x28] sm:$0xff] }
 0x1ab   : > { %v1758_v1 = vld [vmem:[#allocation2 + $0x21] sm:$0xff] }
 0x1ac   : > { %2048 = vrot.lane.b32.xlu0 %v1758_v1, %s3190_s17  ;;  %v1774_v24 = vld [vmem:[#allocation2 + $0x22] sm:$0xff] }
 0x1ad   : > { %v821_v0 = vpop.permute.xlu1 %820  ;;  %v4080_v39 = vld [vmem:[#allocation2 + $0x20] sm:$0xff]  ;;  %v757_v43 = vpop.permute.xlu0 %756  ;;  %v4110_v40 = vld [vmem:[#allocation2 + $0x18] sm:$0xff] }
 0x1ae   : > { %1984 = vrot.lane.b32.xlu1 %v4080_v39, %s3188_s26  ;;  %v1710_v53 = vld [vmem:[#allocation2 + $0x19] sm:$0xff]  ;;  %v1164_v25 = vsel %vm1144_vm5, %v1143_v18, %v757_v43  ;;  %v1184_v11 = vsel %vm1165_vm6, %v1163_v28, %v821_v0  ;;  %v2488_v43 = vld [vmem:[%s4784_s5 + $0x30] sm:$0xff] }
 0x1af   : > { %v1773_v36 = vld [vmem:[#allocation2 + $0x1a] sm:$0xff] }
 0x1b0   : > { %1860 = vrot.lane.b32.xlu0 %v1758_v1, %s3184_s22  ;;  %v2489_v0 = vld [vmem:[%s4784_s5 + $0x38] sm:$0xff] }
 0x1b1   : > { %v1075_v7 = vpop.permute.xlu1 %1074  ;;  %v1012_v58 = vpop.permute.xlu0 %1011  ;;  %3045 = vmatprep.subr.mxu1 %v2489_v0 }
 0x1b2   : > { %v1266_v38 = vsel %vm1249_vm10, %v1245_v12, %v1075_v7  ;;  %1858 = vrot.lane.b32.xlu1 %v1710_v53, %s3184_s22  ;;  %v1246_v16 = vsel %vm1228_vm9, %v1225_v52, %v1012_v58  ;;  %3046 = vmatpush3.msra.mxu1 %v2489_v0  ;;  %v2486_v12 = vld [vmem:[%s4784_s5 + $0x20] sm:$0xff]  ;;  %v2485_v7 = vld [vmem:[%s4784_s5 + $0x18] sm:$0xff] }
 0x1b3   : > { %3037 = vmatprep.mubr.msk.f32.mxu0 %vm1275_vm11, %v1266_v38  ;;  %3047 = vmatprep.subr.mxu1 %v2488_v43 }
 0x1b4   : > { %2112 = vrot.lane.b32.xlu0 %v1774_v24, %s3192_s20  ;;  %3048 = vmatpush3.msra.mxu1 %v2488_v43 }
 0x1b5   : > { %v886_v4 = vpop.permute.xlu1 %885  ;;  %v823_v32 = vpop.permute.xlu0 %822  ;;  %3049 = vmatprep.subr.mxu1 %v2487_v17 }
 0x1b6   : > { %2110 = vrot.lane.b32.xlu1 %v1773_v36, %s3192_s20  ;;  %v1185_v57 = vsel %vm1165_vm6, %v1164_v25, %v823_v32  ;;  %v1205_v55 = vsel %vm1186_vm7, %v1184_v11, %v886_v4  ;;  %3050 = vmatpush3.msra.mxu1 %v2487_v17 }
 0x1b7   : > { %3051 = vmatprep.subr.mxu1 %v2486_v12 }
 0x1b8   : > { %1924 = vrot.lane.b32.xlu0 %v1774_v24, %s3186_s24  ;;  %3052 = vmatpush3.msra.mxu1 %v2486_v12  ;;  %v1584_v24 = vadd.s32 3, %v3999_v63 }
 0x1b9   : > { %v888_v62 = vpop.permute.xlu1 %887  ;;  %v1077_v48 = vpop.permute.xlu0 %1076  ;;  %3053 = vmatprep.subr.mxu1 %v2485_v7 }
 0x1ba   : > { %1922 = vrot.lane.b32.xlu1 %v1773_v36, %s3186_s24  ;;  %v1267_v61 = vsel %vm1249_vm10, %v1246_v16, %v1077_v48  ;;  %v1206_v3 = vsel %vm1186_vm7, %v1185_v57, %v888_v62  ;;  %3054 = vmatpush3.msra.mxu1 %v2485_v7  ;;  %vm1594_vm3 = vcmp.ge.s32.totalorder %v1584_v24, 0  ;;  %vm1604_vm5 = vcmp.lt.s32.totalorder %v1584_v24, 16 }
 0x1bb   : > { %3038 = vmatmul.mubr.msk.f32.gmra.mxu0 %vm1275_vm11, %v1267_v61  ;;  %vm1614_vm7 = vmand %vm1594_vm3, %vm1604_vm5  ;;  %vm2431_vm3 = vcmask 392192   ;;  %vm2414_vm5 = vcmask 326656  }
 0x1bc   : > { %v3021_v8 = vpop.f32.mrf.mxu0  ;;  %1982 = vrot.lane.b32.xlu0 %v4110_v40, %s3188_s26 }
 0x1bd   : > { %v1517_v5 = vmul.f32 %v3021_v8, %v3997_v46  ;;  %v950_v47 = vpop.permute.xlu1 %949  ;;  %v948_v21 = vpop.permute.xlu0 %947 }
 0x1be   : > { %v1426_v2 = vpop.f32.mrf.mxu0  ;;  %v1227_v20 = vsel %vm1207_vm8, %v1206_v3, %v950_v47  ;;  %v1226_v6 = vsel %vm1207_vm8, %v1205_v55, %v948_v21 }
 0x1bf   : > { %v1544_v37 = vadd.f32 %v4005_v13, %v1517_v5  ;;  %v1516_v59 = vmul.f32 %v3997_v46, %v1426_v2  ;;  %v1585_v2 = vadd.s32 4, %v3999_v63 }
 0x1c0   : > { %2046 = vrot.lane.b32.xlu0 %v1710_v53, %s3190_s17  ;;  %v2484_v53 = vld [vmem:[%s4784_s5 + $0x10] sm:$0xff] }
 0x1c1   : > { %v1564_v9 = vmax.f32 %v1544_v37, 0.0  ;;  %v1543_v29 = vadd.f32 %v4005_v13, %v1516_v59  ;;  %v1016_v50 = vpop.permute.xlu1 %1015  ;;  %v1014_v27 = vpop.permute.xlu0 %1013  ;;  %3055 = vmatprep.subr.mxu1 %v2484_v53 }
 0x1c2   : > { %v1248_v49 = vsel %vm1228_vm9, %v1227_v20, %v1016_v50  ;;  %v1247_v23 = vsel %vm1228_vm9, %v1226_v6, %v1014_v27  ;;  %3056 = vmatpush3.msra.mxu1 %v2484_v53  ;;  %vm1595_vm9 = vcmp.ge.s32.totalorder %v1585_v2, 0 }
 0x1c3   : > { %v1626_v10 = vsel %vm4127_vm14, %v1564_v9, 0.0  ;;  %v1563_v60 = vmax.f32 %v1543_v29, 0.0  ;;  %3057 = vmatprep.subr.mxu1 %v2483_v14 }
 0x1c4   : > { %1677 = vst.msk [vmem:[#allocation2 + $0x39] sm:$0xff] %vm1123_vm4, %v1626_v10  ;;  %3058 = vmatpush3.msra.mxu1 %v2483_v14  ;;  %v1586_v10 = vadd.s32 5, %v3999_v63 }
 0x1c5   : > { %v1625_v30 = vsel %vm4127_vm14, %v1563_v60, 0.0  ;;  %v1081_v31 = vpop.permute.xlu1 %1080  ;;  %v1079_v19 = vpop.permute.xlu0 %1078  ;;  %3059 = vmatprep.subr.mxu1 %v2482_v56 }
 0x1c6   : > { %1676 = vst.msk [vmem:[#allocation2 + $0x31] sm:$0xff] %vm1123_vm4, %v1625_v30  ;;  %v1269_v1 = vsel %vm1249_vm10, %v1248_v49, %v1081_v31  ;;  %v1268_v33 = vsel %vm1249_vm10, %v1247_v23, %v1079_v19  ;;  %3060 = vmatpush3.msra.mxu1 %v2482_v56  ;;  %vm1596_vm0 = vcmp.ge.s32.totalorder %v1586_v10, 0  ;;  %vm1606_vm1 = vcmp.lt.s32.totalorder %v1586_v10, 16 }
 0x1c7   : > { %3040 = vmatprep.mubr.msk.f32.mxu0 %vm1275_vm11, %v1268_v33  ;;  %vm1616_vm2 = vmand %vm1596_vm0, %vm1606_vm1 }
 0x1c8   : > { %3041 = vmatmul.mubr.msk.f32.gmra.mxu0 %vm1275_vm11, %v1269_v1  ;;  %vm1605_vm11 = vcmp.lt.s32.totalorder %v1585_v2, 16 }
 0x1c9   : > { %vm1615_vm15 = vmand %vm1595_vm9, %vm1605_vm11  ;;  %vm2465_vm9 = vcmask 523264   ;;  %vm2491_vm11 = vcmask 588800  }
 0x1cb   : > { %v1807_v38 = vld [vmem:[#allocation2 + $0x39] sm:$0xff] }
 0x1cc   : > { %v1823_v61 = vld [vmem:[#allocation2 + $0x3a] sm:$0xff] }
 0x1cd   : > { %v4163_v45 = vld [vmem:[#allocation2 + $0x30] sm:$0xff]  ;;  %v4165_v35 = vld [vmem:[#allocation2 + $0x38] sm:$0xff] }
 0x1ce   : > { %2174 = vrot.lane.b32.xlu1 %v4163_v45, %s3193_s21  ;;  %2176 = vrot.lane.b32.xlu0 %v4165_v35, %s3193_s21  ;;  %v1806_v58 = vld [vmem:[#allocation2 + $0x31] sm:$0xff] }
 0x1cf   : > { %v1822_v36 = vld [vmem:[#allocation2 + $0x32] sm:$0xff] }
 0x1d2   : > { %1986 = vrot.lane.b32.xlu1 %v4163_v45, %s3188_s26  ;;  %1988 = vrot.lane.b32.xlu0 %v4165_v35, %s3188_s26 }
 0x1d6   : > { %2238 = vrot.lane.b32.xlu1 %v1806_v58, %s3194_s14  ;;  %2240 = vrot.lane.b32.xlu0 %v1807_v38, %s3194_s14 }
 0x1da   : > { %2050 = vrot.lane.b32.xlu1 %v1806_v58, %s3190_s17  ;;  %1862 = vrot.lane.b32.xlu0 %v1806_v58, %s3184_s22 }
 0x1dc   : > { %v3024_v41 = vpop.f32.mrf.mxu0 }
 0x1dd   : > { %v1519_v4 = vmul.f32 %v3024_v41, %v3997_v46 }
 0x1de   : > { %2302 = vrot.lane.b32.xlu1 %v1822_v36, %s3195_s27  ;;  %v1436_v32 = vpop.f32.mrf.mxu0  ;;  %2114 = vrot.lane.b32.xlu0 %v1822_v36, %s3192_s20 }
 0x1df   : > { %v1546_v22 = vadd.f32 %v4005_v13, %v1519_v4  ;;  %v1518_v42 = vmul.f32 %v3997_v46, %v1436_v32 }
 0x1e1   : > { %v1566_v52 = vmax.f32 %v1546_v22, 0.0  ;;  %v1545_v16 = vadd.f32 %v4005_v13, %v1518_v42  ;;  %v1587_v42 = vadd.s32 6, %v3999_v63 }
 0x1e2   : > { %2052 = vrot.lane.b32.xlu1 %v1807_v38, %s3190_s17  ;;  %1864 = vrot.lane.b32.xlu0 %v1807_v38, %s3184_s22 }
 0x1e3   : > { %v1628_v62 = vsel %vm1614_vm7, %v1566_v52, 0.0  ;;  %v1565_v48 = vmax.f32 %v1545_v16, 0.0  ;;  %vm1597_vm12 = vcmp.ge.s32.totalorder %v1587_v42, 0  ;;  %vm1607_vm13 = vcmp.lt.s32.totalorder %v1587_v42, 16 }
 0x1e4   : > { %1679 = vst.msk [vmem:[#allocation2 + $0x51] sm:$0xff] %vm1123_vm4, %v1628_v62  ;;  %vm1617_vm14 = vmand %vm1597_vm12, %vm1607_vm13 }
 0x1e5   : > { %v1627_v51 = vsel %vm1614_vm7, %v1565_v48, 0.0  ;;  %vm2448_vm7 = vcmask 457728  }
 0x1e6   : > { %1678 = vst.msk [vmem:[#allocation2 + $0x49] sm:$0xff] %vm1123_vm4, %v1627_v51  ;;  %2304 = vrot.lane.b32.xlu1 %v1823_v61, %s3195_s27  ;;  %2116 = vrot.lane.b32.xlu0 %v1823_v61, %s3192_s20 }
 0x1ea   : > { %1926 = vrot.lane.b32.xlu1 %v1822_v36, %s3186_s24  ;;  %1928 = vrot.lane.b32.xlu0 %v1823_v61, %s3186_s24 }
 0x1eb   : > { %v1809_v21 = vld [vmem:[#allocation2 + $0x51] sm:$0xff] }
 0x1ec   : > { %v1825_v50 = vld [vmem:[#allocation2 + $0x52] sm:$0xff] }
 0x1ed   : > { %v4212_v8 = vld [vmem:[#allocation2 + $0x48] sm:$0xff]  ;;  %v4214_v5 = vld [vmem:[#allocation2 + $0x50] sm:$0xff] }
 0x1ee   : > { %2178 = vrot.lane.b32.xlu1 %v4212_v8, %s3193_s21  ;;  %2180 = vrot.lane.b32.xlu0 %v4214_v5, %s3193_s21  ;;  %v1808_v47 = vld [vmem:[#allocation2 + $0x49] sm:$0xff] }
 0x1ef   : > { %v1824_v37 = vld [vmem:[#allocation2 + $0x4a] sm:$0xff] }
 0x1f2   : > { %1990 = vrot.lane.b32.xlu1 %v4212_v8, %s3188_s26  ;;  %1992 = vrot.lane.b32.xlu0 %v4214_v5, %s3188_s26 }
 0x1f6   : > { %2242 = vrot.lane.b32.xlu1 %v1808_v47, %s3194_s14  ;;  %2244 = vrot.lane.b32.xlu0 %v1809_v21, %s3194_s14 }
 0x1fa   : > { %2054 = vrot.lane.b32.xlu1 %v1808_v47, %s3190_s17  ;;  %1866 = vrot.lane.b32.xlu0 %v1808_v47, %s3184_s22 }
 0x1fc   : > { %v3027_v26 = vpop.f32.mrf.mxu0 }
 0x1fd   : > { %v1521_v54 = vmul.f32 %v3027_v26, %v3997_v46 }
 0x1fe   : > { %2306 = vrot.lane.b32.xlu1 %v1824_v37, %s3195_s27  ;;  %v1446_v59 = vpop.f32.mrf.mxu0  ;;  %2118 = vrot.lane.b32.xlu0 %v1824_v37, %s3192_s20  ;;  %v4271_v1 = vpop.permute.xlu1 %1856 }
 0x1ff   : > { %v1548_v34 = vadd.f32 %v4005_v13, %v1521_v54  ;;  %v1520_v18 = vmul.f32 %v3997_v46, %v1446_v59 }
 0x200   : > { %v4255_v57 = vpop.permute.xlu0 %1854 }
 0x201   : > { %v1568_v44 = vmax.f32 %v1548_v34, 0.0  ;;  %v1547_v28 = vadd.f32 %v4005_v13, %v1520_v18 }
 0x202   : > { %2056 = vrot.lane.b32.xlu1 %v1809_v21, %s3190_s17  ;;  %1868 = vrot.lane.b32.xlu0 %v1809_v21, %s3184_s22  ;;  %v4280_v53 = vpop.permute.xlu1 %1920 }
 0x203   : > { %v1630_v25 = vsel %vm1615_vm15, %v1568_v44, 0.0  ;;  %v1567_v9 = vmax.f32 %v1547_v28, 0.0 }
 0x204   : > { %1681 = vst.msk [vmem:[#allocation2 + $0x69] sm:$0xff] %vm1123_vm4, %v1630_v25  ;;  %v4260_v60 = vpop.permute.xlu0 %1918 }
 0x205   : > { %v1629_v29 = vsel %vm1615_vm15, %v1567_v9, 0.0  ;;  %v1692_v9 = vld [vmem:[#allocation2] sm:$0xff] }
 0x206   : > { %1680 = vst.msk [vmem:[#allocation2 + $0x61] sm:$0xff] %vm1123_vm4, %v1629_v29  ;;  %2308 = vrot.lane.b32.xlu1 %v1825_v50, %s3195_s27  ;;  %2120 = vrot.lane.b32.xlu0 %v1825_v50, %s3192_s20  ;;  %v2350_v29 = vsel %vm1123_vm4, %v1692_v9, %v4255_v57 }
 0x20a   : > { %1930 = vrot.lane.b32.xlu1 %v1824_v37, %s3186_s24  ;;  %1932 = vrot.lane.b32.xlu0 %v1825_v50, %s3186_s24 }
 0x20b   : > { %v1811_v3 = vld [vmem:[#allocation2 + $0x69] sm:$0xff] }
 0x20c   : > { %v1827_v7 = vld [vmem:[#allocation2 + $0x6a] sm:$0xff] }
 0x20d   : > { %v4243_v27 = vld [vmem:[#allocation2 + $0x60] sm:$0xff]  ;;  %v4245_v11 = vld [vmem:[#allocation2 + $0x68] sm:$0xff] }
 0x20e   : > { %2182 = vrot.lane.b32.xlu1 %v4243_v27, %s3193_s21  ;;  %2184 = vrot.lane.b32.xlu0 %v4245_v11, %s3193_s21  ;;  %v1810_v55 = vld [vmem:[#allocation2 + $0x61] sm:$0xff] }
 0x20f   : > { %v1826_v30 = vld [vmem:[#allocation2 + $0x62] sm:$0xff] }
 0x212   : > { %1994 = vrot.lane.b32.xlu1 %v4243_v27, %s3188_s26  ;;  %1996 = vrot.lane.b32.xlu0 %v4245_v11, %s3188_s26 }
 0x216   : > { %2246 = vrot.lane.b32.xlu1 %v1810_v55, %s3194_s14  ;;  %2248 = vrot.lane.b32.xlu0 %v1811_v3, %s3194_s14 }
 0x21a   : > { %2058 = vrot.lane.b32.xlu1 %v1810_v55, %s3190_s17  ;;  %1870 = vrot.lane.b32.xlu0 %v1810_v55, %s3184_s22 }
 0x21b   : > { %v3030_v20 = vpop.f32.mrf.mxu0 }
 0x21c   : > { %v1523_v6 = vmul.f32 %v3030_v20, %v3997_v46 }
 0x21d   : > { %v1456_v49 = vpop.f32.mrf.mxu0 }
 0x21e   : > { %v1550_v23 = vadd.f32 %v4005_v13, %v1523_v6  ;;  %2310 = vrot.lane.b32.xlu1 %v1826_v30, %s3195_s27  ;;  %v1522_v31 = vmul.f32 %v3997_v46, %v1456_v49  ;;  %2122 = vrot.lane.b32.xlu0 %v1826_v30, %s3192_s20  ;;  %v4269_v19 = vpop.permute.xlu0 %2048 }
 0x220   : > { %v1570_v33 = vmax.f32 %v1550_v23, 0.0  ;;  %v1549_v15 = vadd.f32 %v4005_v13, %v1522_v31  ;;  %v4284_v58 = vpop.permute.xlu1 %1984  ;;  %v1693_v23 = vld [vmem:[#allocation2 + $0x8] sm:$0xff] }
 0x222   : > { %v1632_v0 = vsel %vm1616_vm2, %v1570_v33, 0.0  ;;  %v1569_v43 = vmax.f32 %v1549_v15, 0.0  ;;  %2060 = vrot.lane.b32.xlu1 %v1811_v3, %s3190_s17  ;;  %1872 = vrot.lane.b32.xlu0 %v1811_v3, %s3184_s22  ;;  %v4277_v12 = vpop.permute.xlu0 %1860  ;;  %v2366_v3 = vsel %vm1165_vm6, %v2350_v29, %v4260_v60  ;;  %v2351_v33 = vsel %vm1123_vm4, %v1693_v23, %v4271_v1 }
 0x223   : > { %1683 = vst.msk [vmem:[#allocation2 + $0x81] sm:$0xff] %vm1123_vm4, %v1632_v0 }
 0x224   : > { %v1631_v17 = vsel %vm1616_vm2, %v1569_v43, 0.0  ;;  %v4298_v56 = vpop.permute.xlu1 %1858 }
 0x225   : > { %1682 = vst.msk [vmem:[#allocation2 + $0x79] sm:$0xff] %vm1123_vm4, %v1631_v17  ;;  %v2367_v17 = vsel %vm1165_vm6, %v2351_v33, %v4280_v53  ;;  %v2352_v23 = vsel %vm1123_vm4, %v4110_v40, %v4298_v56 }
 0x226   : > { %2312 = vrot.lane.b32.xlu1 %v1827_v7, %s3195_s27  ;;  %2124 = vrot.lane.b32.xlu0 %v1827_v7, %s3192_s20  ;;  %v4286_v38 = vpop.permute.xlu0 %2112 }
 0x228   : > { %v2111_v32 = vpop.permute.xlu1 %2110 }
 0x22a   : > { %1934 = vrot.lane.b32.xlu1 %v1826_v30, %s3186_s24  ;;  %1936 = vrot.lane.b32.xlu0 %v1827_v7, %s3186_s24  ;;  %v4300_v41 = vpop.permute.xlu0 %1924  ;;  %v1813_v36 = vld [vmem:[#allocation2 + $0x81] sm:$0xff] }
 0x22b   : > { %v1829_v25 = vld [vmem:[#allocation2 + $0x82] sm:$0xff] }
 0x22c   : > { %v4290_v14 = vld [vmem:[#allocation2 + $0x78] sm:$0xff]  ;;  %v4292_v24 = vld [vmem:[#allocation2 + $0x80] sm:$0xff]  ;;  %v4311_v16 = vpop.permute.xlu1 %1922 }
 0x22d   : > { %v1812_v4 = vld [vmem:[#allocation2 + $0x79] sm:$0xff] }
 0x22e   : > { %2186 = vrot.lane.b32.xlu1 %v4290_v14, %s3193_s21  ;;  %2188 = vrot.lane.b32.xlu0 %v4292_v24, %s3193_s21  ;;  %v1983_v22 = vpop.permute.xlu0 %1982  ;;  %v1828_v51 = vld [vmem:[#allocation2 + $0x7a] sm:$0xff] }
 0x22f   : > { %v2382_v10 = vsel %vm1207_vm8, %v2366_v3, %v1983_v22 }
 0x232   : > { %1998 = vrot.lane.b32.xlu1 %v4290_v14, %s3188_s26  ;;  %2000 = vrot.lane.b32.xlu0 %v4292_v24, %s3188_s26  ;;  %v2047_v62 = vpop.permute.xlu0 %2046 }
 0x233   : > { %v2398_v20 = vsel %vm1249_vm10, %v2382_v10, %v2047_v62 }
 0x234   : > { %v2415_v60 = vsel %vm2414_vm5, %v2398_v20, %v2111_v32 }
 0x236   : > { %2250 = vrot.lane.b32.xlu1 %v1812_v4, %s3194_s14  ;;  %2252 = vrot.lane.b32.xlu0 %v1813_v36, %s3194_s14 }
 0x23a   : > { %2062 = vrot.lane.b32.xlu1 %v1812_v4, %s3190_s17  ;;  %1874 = vrot.lane.b32.xlu0 %v1812_v4, %s3184_s22  ;;  %v2383_v4 = vsel %vm1207_vm8, %v2367_v17, %v4284_v58 }
 0x23b   : > { %v3033_v52 = vpop.f32.mrf.mxu0  ;;  %v2399_v53 = vsel %vm1249_vm10, %v2383_v4, %v4269_v19 }
 0x23c   : > { %v1525_v48 = vmul.f32 %v3033_v52, %v3997_v46  ;;  %v2416_v58 = vsel %vm2414_vm5, %v2399_v53, %v4286_v38 }
 0x23d   : > { %v1466_v61 = vpop.f32.mrf.mxu0 }
 0x23e   : > { %v1552_v47 = vadd.f32 %v4005_v13, %v1525_v48  ;;  %2314 = vrot.lane.b32.xlu1 %v1828_v51, %s3195_s27  ;;  %v1524_v21 = vmul.f32 %v3997_v46, %v1466_v61  ;;  %2126 = vrot.lane.b32.xlu0 %v1828_v51, %s3192_s20 }
 0x240   : > { %v1572_v2 = vmax.f32 %v1552_v47, 0.0  ;;  %v1551_v26 = vadd.f32 %v4005_v13, %v1524_v21  ;;  %v2175_v54 = vpop.permute.xlu1 %2174  ;;  %v2177_v37 = vpop.permute.xlu0 %2176 }
 0x241   : > { %v2432_v31 = vsel %vm2431_vm3, %v2415_v60, %v2175_v54  ;;  %v2433_v42 = vsel %vm2431_vm3, %v2416_v58, %v2177_v37 }
 0x242   : > { %v1634_v59 = vsel %vm1617_vm14, %v1572_v2, 0.0  ;;  %v1571_v34 = vmax.f32 %v1551_v26, 0.0  ;;  %2064 = vrot.lane.b32.xlu1 %v1813_v36, %s3190_s17  ;;  %1876 = vrot.lane.b32.xlu0 %v1813_v36, %s3184_s22 }
 0x243   : > { %1685 = vst.msk [vmem:[#allocation2 + $0x99] sm:$0xff] %vm1123_vm4, %v1634_v59 }
 0x244   : > { %v1633_v18 = vsel %vm1617_vm14, %v1571_v34, 0.0  ;;  %v4322_v44 = vpop.permute.xlu1 %1986  ;;  %v4324_v28 = vpop.permute.xlu0 %1988 }
 0x245   : > { %1684 = vst.msk [vmem:[#allocation2 + $0x91] sm:$0xff] %vm1123_vm4, %v1633_v18 }
 0x246   : > { %2316 = vrot.lane.b32.xlu1 %v1829_v25, %s3195_s27  ;;  %2128 = vrot.lane.b32.xlu0 %v1829_v25, %s3192_s20 }
 0x248   : > { %v2239_v50 = vpop.permute.xlu1 %2238  ;;  %v2241_v55 = vpop.permute.xlu0 %2240 }
 0x249   : > { %v2449_v15 = vsel %vm2448_vm7, %v2432_v31, %v2239_v50  ;;  %v2450_v52 = vsel %vm2448_vm7, %v2433_v42, %v2241_v55  ;;  %v2368_v31 = vsel %vm1165_vm6, %v2352_v23, %v4311_v16 }
 0x24a   : > { %1938 = vrot.lane.b32.xlu1 %v1828_v51, %s3186_s24  ;;  %1940 = vrot.lane.b32.xlu0 %v1829_v25, %s3186_s24  ;;  %v1815_v22 = vld [vmem:[#allocation2 + $0x99] sm:$0xff]  ;;  %v1588_v51 = vadd.s32 7, %v3999_v63  ;;  %v2384_v33 = vsel %vm1207_vm8, %v2368_v31, %v4322_v44 }
 0x24b   : > { %v1831_v10 = vld [vmem:[#allocation2 + $0x9a] sm:$0xff] }
 0x24c   : > { %v4337_v6 = vpop.permute.xlu1 %2050  ;;  %v4339_v30 = vpop.permute.xlu0 %1862  ;;  %v4341_v49 = vld [vmem:[#allocation2 + $0x90] sm:$0xff]  ;;  %v4343_v57 = vld [vmem:[#allocation2 + $0x98] sm:$0xff]  ;;  %vm1598_vm15 = vcmp.ge.s32.totalorder %v1588_v51, 0  ;;  %vm1608_vm0 = vcmp.lt.s32.totalorder %v1588_v51, 16 }
 0x24d   : > { %v1814_v32 = vld [vmem:[#allocation2 + $0x91] sm:$0xff]  ;;  %vm1618_vm1 = vmand %vm1598_vm15, %vm1608_vm0  ;;  %v2400_v40 = vsel %vm1249_vm10, %v2384_v33, %v4337_v6  ;;  %v2353_v6 = vsel %vm1123_vm4, %v4080_v39, %v4277_v12 }
 0x24e   : > { %2190 = vrot.lane.b32.xlu1 %v4341_v49, %s3193_s21  ;;  %2192 = vrot.lane.b32.xlu0 %v4343_v57, %s3193_s21  ;;  %v1830_v2 = vld [vmem:[#allocation2 + $0x92] sm:$0xff] }
 0x250   : > { %v2303_v0 = vpop.permute.xlu1 %2302  ;;  %v4354_v43 = vpop.permute.xlu0 %2114 }
 0x251   : > { %v2466_v7 = vsel %vm2465_vm9, %v2449_v15, %v2303_v0  ;;  %v2417_v56 = vsel %vm2414_vm5, %v2400_v40, %v4354_v43  ;;  %v2369_v43 = vsel %vm1165_vm6, %v2353_v6, %v4300_v41 }
 0x252   : > { %2002 = vrot.lane.b32.xlu1 %v4341_v49, %s3188_s26  ;;  %2004 = vrot.lane.b32.xlu0 %v4343_v57, %s3188_s26 }
 0x253   : > { %3061 = vmatprep.mubr.msk.f32.mxu1 %vm2491_vm11, %v2466_v7 }
 0x254   : > { %v4366_v1 = vpop.permute.xlu1 %2052  ;;  %v4368_v36 = vpop.permute.xlu0 %1864 }
 0x256   : > { %2254 = vrot.lane.b32.xlu1 %v1814_v32, %s3194_s14  ;;  %2256 = vrot.lane.b32.xlu0 %v1815_v22, %s3194_s14 }
 0x258   : > { %v2305_v62 = vpop.permute.xlu1 %2304  ;;  %v4378_v48 = vpop.permute.xlu0 %2116 }
 0x259   : > { %v2467_v19 = vsel %vm2465_vm9, %v2450_v52, %v2305_v62 }
 0x25a   : > { %2066 = vrot.lane.b32.xlu1 %v1814_v32, %s3190_s17  ;;  %1878 = vrot.lane.b32.xlu0 %v1814_v32, %s3184_s22 }
 0x25b   : > { %3062 = vmatmul.mubr.msk.f32.vlgmr.msra.gmra.mxu1 %vm2491_vm11, %v2467_v19  ;;  %v3036_v38 = vpop.f32.mrf.mxu0 }
 0x25c   : > { %v4385_v61 = vpop.permute.xlu1 %1926  ;;  %v1527_v47 = vmul.f32 %v3036_v38, %v3997_v46  ;;  %v4388_v21 = vpop.permute.xlu0 %1928  ;;  %v1589_v38 = vadd.s32 8, %v3999_v63 }
 0x25d   : > { %v1476_v26 = vpop.f32.mrf.mxu0 }
 0x25e   : > { %v1554_v54 = vadd.f32 %v4005_v13, %v1527_v47  ;;  %2318 = vrot.lane.b32.xlu1 %v1830_v2, %s3195_s27  ;;  %v1526_v37 = vmul.f32 %v3997_v46, %v1476_v26  ;;  %2130 = vrot.lane.b32.xlu0 %v1830_v2, %s3192_s20  ;;  %vm1599_vm2 = vcmp.ge.s32.totalorder %v1589_v38, 0  ;;  %vm1609_vm12 = vcmp.lt.s32.totalorder %v1589_v38, 16 }
 0x25f   : > { %vm1619_vm13 = vmand %vm1599_vm2, %vm1609_vm12 }
 0x260   : > { %v1574_v59 = vmax.f32 %v1554_v54, 0.0  ;;  %v1553_v34 = vadd.f32 %v4005_v13, %v1526_v37  ;;  %v2179_v18 = vpop.permute.xlu1 %2178  ;;  %v2181_v25 = vpop.permute.xlu0 %2180 }
 0x261   : > { %v2434_v16 = vsel %vm2431_vm3, %v2417_v56, %v2179_v18  ;;  %v2354_v56 = vsel %vm1123_vm4, %v4163_v45, %v4339_v30  ;;  %v3142_v45 = vld [vmem:[%s4783_s4] ss:$0 sm:$0xff] }
 0x262   : > { %v1636_v9 = vsel %vm1618_vm1, %v1574_v59, 0.0  ;;  %v1573_v29 = vmax.f32 %v1553_v34, 0.0  ;;  %2068 = vrot.lane.b32.xlu1 %v1815_v22, %s3190_s17  ;;  %1880 = vrot.lane.b32.xlu0 %v1815_v22, %s3184_s22  ;;  %v2385_v22 = vsel %vm1207_vm8, %v2369_v43, %v4324_v28 }
 0x263   : > { %1687 = vst.msk [vmem:[#allocation2 + $0xb1] sm:$0xff] %vm1123_vm4, %v1636_v9  ;;  %v2401_v39 = vsel %vm1249_vm10, %v2385_v22, %v4366_v1 }
 0x264   : > { %v1635_v50 = vsel %vm1618_vm1, %v1573_v29, 0.0  ;;  %v4398_v55 = vpop.permute.xlu1 %1990  ;;  %v4400_v3 = vpop.permute.xlu0 %1992  ;;  %v2418_v62 = vsel %vm2414_vm5, %v2401_v39, %v4378_v48 }
 0x265   : > { %1686 = vst.msk [vmem:[#allocation2 + $0xa9] sm:$0xff] %vm1123_vm4, %v1635_v50  ;;  %v2435_v41 = vsel %vm2431_vm3, %v2418_v62, %v2181_v25 }
 0x266   : > { %2320 = vrot.lane.b32.xlu1 %v1831_v10, %s3195_s27  ;;  %2132 = vrot.lane.b32.xlu0 %v1831_v10, %s3192_s20 }
 0x268   : > { %v2243_v20 = vpop.permute.xlu1 %2242  ;;  %v2245_v60 = vpop.permute.xlu0 %2244 }
 0x269   : > { %v2451_v44 = vsel %vm2448_vm7, %v2434_v16, %v2243_v20  ;;  %v2452_v28 = vsel %vm2448_vm7, %v2435_v41, %v2245_v60  ;;  %v3141_v16 = vld [vmem:[%s4782_s3] ss:$0 sm:$0xff] }
 0x26a   : > { %1942 = vrot.lane.b32.xlu1 %v1830_v2, %s3186_s24  ;;  %1944 = vrot.lane.b32.xlu0 %v1831_v10, %s3186_s24  ;;  %v1817_v52 = vld [vmem:[#allocation2 + $0xb1] sm:$0xff] }
 0x26b   : > { %v1833_v23 = vld [vmem:[#allocation2 + $0xb2] sm:$0xff] }
 0x26c   : > { %v4414_v15 = vpop.permute.xlu1 %2054  ;;  %v4416_v0 = vpop.permute.xlu0 %1866  ;;  %v4418_v17 = vld [vmem:[#allocation2 + $0xa8] sm:$0xff]  ;;  %v4420_v7 = vld [vmem:[#allocation2 + $0xb0] sm:$0xff] }
 0x26d   : > { %v1816_v12 = vld [vmem:[#allocation2 + $0xa9] sm:$0xff] }
 0x26e   : > { %2194 = vrot.lane.b32.xlu1 %v4418_v17, %s3193_s21  ;;  %2196 = vrot.lane.b32.xlu0 %v4420_v7, %s3193_s21  ;;  %v1832_v54 = vld [vmem:[#allocation2 + $0xaa] sm:$0xff] }
 0x270   : > { %v2307_v4 = vpop.permute.xlu1 %2306  ;;  %v4432_v53 = vpop.permute.xlu0 %2118 }
 0x271   : > { %v2468_v32 = vsel %vm2465_vm9, %v2451_v44, %v2307_v4 }
 0x272   : > { %2006 = vrot.lane.b32.xlu1 %v4418_v17, %s3188_s26  ;;  %2008 = vrot.lane.b32.xlu0 %v4420_v7, %s3188_s26 }
 0x273   : > { %3064 = vmatprep.mubr.msk.f32.mxu1 %vm2491_vm11, %v2468_v32 }
 0x274   : > { %v4447_v58 = vpop.permute.xlu1 %2056  ;;  %v4449_v42 = vpop.permute.xlu0 %1868 }
 0x276   : > { %2258 = vrot.lane.b32.xlu1 %v1816_v12, %s3194_s14  ;;  %2260 = vrot.lane.b32.xlu0 %v1817_v52, %s3194_s14 }
 0x278   : > { %v2309_v51 = vpop.permute.xlu1 %2308  ;;  %v4459_v19 = vpop.permute.xlu0 %2120 }
 0x279   : > { %v2469_v1 = vsel %vm2465_vm9, %v2452_v28, %v2309_v51 }
 0x27a   : > { %2070 = vrot.lane.b32.xlu1 %v1816_v12, %s3190_s17  ;;  %1882 = vrot.lane.b32.xlu0 %v1816_v12, %s3184_s22 }
 0x27b   : > { %3065 = vmatmul.mubr.msk.f32.gmra.mxu1 %vm2491_vm11, %v2469_v1  ;;  %v3039_v48 = vpop.f32.mrf.mxu0 }
 0x27c   : > { %v4466_v47 = vpop.permute.xlu1 %1930  ;;  %v1529_v2 = vmul.f32 %v3039_v48, %v3997_v46  ;;  %v4469_v26 = vpop.permute.xlu0 %1932 }
 0x27d   : > { %v1486_v37 = vpop.f32.mrf.mxu0 }
 0x27e   : > { %v1556_v59 = vadd.f32 %v4005_v13, %v1529_v2  ;;  %2322 = vrot.lane.b32.xlu1 %v1832_v54, %s3195_s27  ;;  %v1528_v34 = vmul.f32 %v3997_v46, %v1486_v37  ;;  %2134 = vrot.lane.b32.xlu0 %v1832_v54, %s3192_s20 }
 0x280   : > { %v1576_v18 = vmax.f32 %v1556_v59, 0.0  ;;  %v1555_v25 = vadd.f32 %v4005_v13, %v1528_v34  ;;  %v2183_v9 = vpop.permute.xlu1 %2182  ;;  %v4476_v29 = vpop.permute.xlu0 %2184  ;;  %v1590_v13 = vadd.s32 9, %v3999_v63  ;;  %v2370_v63 = vsel %vm1165_vm6, %v2354_v56, %v4385_v61 }
 0x281   : > { %v2386_v32 = vsel %vm1207_vm8, %v2370_v63, %v4398_v55 }
 0x282   : > { %v1638_v50 = vsel %vm1619_vm13, %v1576_v18, 0.0  ;;  %v1575_v10 = vmax.f32 %v1555_v25, 0.0  ;;  %2072 = vrot.lane.b32.xlu1 %v1817_v52, %s3190_s17  ;;  %1884 = vrot.lane.b32.xlu0 %v1817_v52, %s3184_s22  ;;  %vm1600_vm14 = vcmp.ge.s32.totalorder %v1590_v13, 0  ;;  %vm1610_vm15 = vcmp.lt.s32.totalorder %v1590_v13, 16 }
 0x283   : > { %1689 = vst.msk [vmem:[#allocation2 + $0xc9] sm:$0xff] %vm1123_vm4, %v1638_v50  ;;  %v2402_v52 = vsel %vm1249_vm10, %v2386_v32, %v4414_v15  ;;  %vm1620_vm0 = vmand %vm1600_vm14, %vm1610_vm15  ;;  %v2356_v32 = vsel %vm1123_vm4, %v4212_v8, %v4416_v0 }
 0x284   : > { %v1637_v20 = vsel %vm1619_vm13, %v1575_v10, 0.0  ;;  %v4481_v60 = vpop.permute.xlu1 %1994  ;;  %v4483_v46 = vpop.permute.xlu0 %1996  ;;  %v2419_v61 = vsel %vm2414_vm5, %v2402_v52, %v4432_v53  ;;  %v2355_v53 = vsel %vm1123_vm4, %v4165_v35, %v4368_v36 }
 0x285   : > { %1688 = vst.msk [vmem:[#allocation2 + $0xc1] sm:$0xff] %vm1123_vm4, %v1637_v20  ;;  %v2436_v41 = vsel %vm2431_vm3, %v2419_v61, %v2183_v9 }
 0x286   : > { %2324 = vrot.lane.b32.xlu1 %v1833_v23, %s3195_s27  ;;  %2136 = vrot.lane.b32.xlu0 %v1833_v23, %s3192_s20 }
 0x288   : > { %v2247_v31 = vpop.permute.xlu1 %2246  ;;  %v2249_v33 = vpop.permute.xlu0 %2248 }
 0x289   : > { %v3042_v40 = vpop.f32.mrf.mxu0  ;;  %v2453_v28 = vsel %vm2448_vm7, %v2436_v41, %v2247_v31  ;;  %v2357_v41 = vsel %vm1123_vm4, %v4214_v5, %v4449_v42 }
 0x28a   : > { %v1531_v44 = vmul.f32 %v3141_v16, %v3042_v40  ;;  %1946 = vrot.lane.b32.xlu1 %v1832_v54, %s3186_s24  ;;  %1948 = vrot.lane.b32.xlu0 %v1833_v23, %s3186_s24  ;;  %v2371_v54 = vsel %vm1165_vm6, %v2355_v53, %v4388_v21  ;;  %v1819_v18 = vld [vmem:[#allocation2 + $0xc9] sm:$0xff]  ;;  %s2896_s24 = sshll.u32 %s4805_s12, 1 }
 0x28b   : > { %v1496_v4 = vpop.f32.mrf.mxu0  ;;  %v2387_v37 = vsel %vm1207_vm8, %v2371_v54, %v4400_v3  ;;  %v1835_v23 = vld [vmem:[#allocation2 + $0xca] sm:$0xff] }
 0x28c   : > { %v1558_v30 = vadd.f32 %v3142_v45, %v1531_v44  ;;  %v1530_v6 = vmul.f32 %v3141_v16, %v1496_v4  ;;  %v4504_v43 = vpop.permute.xlu1 %2058  ;;  %v4506_v22 = vpop.permute.xlu0 %1870  ;;  %v1802_v39 = vld [vmem:[#allocation2 + $0xc0] sm:$0xff]  ;;  %v1803_v12 = vld [vmem:[#allocation2 + $0xc8] sm:$0xff]  ;;  %v2403_v35 = vsel %vm1249_vm10, %v2387_v37, %v4447_v58 }
 0x28d   : > { %v1818_v36 = vld [vmem:[#allocation2 + $0xc1] sm:$0xff]  ;;  %v2420_v25 = vsel %vm2414_vm5, %v2403_v35, %v4459_v19 }
 0x28e   : > { %v1578_v55 = vmax.f32 %v1558_v30, 0.0  ;;  %v1557_v62 = vadd.f32 %v3142_v45, %v1530_v6  ;;  %2198 = vrot.lane.b32.xlu1 %v1802_v39, %s3193_s21  ;;  %2200 = vrot.lane.b32.xlu0 %v1803_v12, %s3193_s21  ;;  %v2437_v21 = vsel %vm2431_vm3, %v2420_v25, %v4476_v29  ;;  %v1834_v20 = vld [vmem:[#allocation2 + $0xc2] sm:$0xff]  ;;  %v2372_v45 = vsel %vm1165_vm6, %v2356_v32, %v4466_v47 }
 0x28f   : > { %v2454_v3 = vsel %vm2448_vm7, %v2437_v21, %v2249_v33  ;;  %v2388_v30 = vsel %vm1207_vm8, %v2372_v45, %v4481_v60  ;;  %v2358_v25 = vsel %vm1123_vm4, %v4243_v27, %v4506_v22 }
 0x290   : > { %v1640_v51 = vsel %vm1620_vm0, %v1578_v55, 0.0  ;;  %v1577_v38 = vmax.f32 %v1557_v62, 0.0  ;;  %v2311_v1 = vpop.permute.xlu1 %2310  ;;  %v2123_v48 = vpop.permute.xlu0 %2122 }
 0x291   : > { %1691 = vst.msk [vmem:[#allocation2 + $0xe1] sm:$0xff] %vm1123_vm4, %v1640_v51  ;;  %v2470_v15 = vsel %vm2465_vm9, %v2453_v28, %v2311_v1 }
 0x292   : > { %v1639_v2 = vsel %vm1620_vm0, %v1577_v38, 0.0  ;;  %2010 = vrot.lane.b32.xlu1 %v1802_v39, %s3188_s26  ;;  %2012 = vrot.lane.b32.xlu0 %v1803_v12, %s3188_s26  ;;  %v2404_v12 = vsel %vm1249_vm10, %v2388_v30, %v4504_v43  ;;  %v2373_v43 = vsel %vm1165_vm6, %v2357_v41, %v4469_v26  ;;  %s2897_s26 = sshll.u32 %s4801_s28, 5 }
 0x293   : > { %1690 = vst.msk [vmem:[#allocation2 + $0xd9] sm:$0xff] %vm1123_vm4, %v1639_v2  ;;  %3067 = vmatprep.mubr.msk.f32.mxu1 %vm2491_vm11, %v2470_v15  ;;  %v2421_v61 = vsel %vm2414_vm5, %v2404_v12, %v2123_v48  ;;  %v2389_v28 = vsel %vm1207_vm8, %v2373_v43, %v4483_v46 }
 0x294   : > { %v2061_v59 = vpop.permute.xlu1 %2060  ;;  %v4530_v34 = vpop.permute.xlu0 %1872 }
 0x295   : > { %v2405_v1 = vsel %vm1249_vm10, %v2389_v28, %v2061_v59  ;;  %v2359_v27 = vsel %vm1123_vm4, %v4245_v11, %v4530_v34 }
 0x296   : > { %2262 = vrot.lane.b32.xlu1 %v1818_v36, %s3194_s14  ;;  %2264 = vrot.lane.b32.xlu0 %v1819_v18, %s3194_s14 }
 0x298   : > { %v2313_v9 = vpop.permute.xlu1 %2312  ;;  %v2125_v50 = vpop.permute.xlu0 %2124  ;;  %v1821_v52 = vld [vmem:[#allocation2 + $0xe1] sm:$0xff] }
 0x299   : > { %v2471_v10 = vsel %vm2465_vm9, %v2454_v3, %v2313_v9  ;;  %v1837_v60 = vld [vmem:[#allocation2 + $0xe2] sm:$0xff]  ;;  %v2422_v48 = vsel %vm2414_vm5, %v2405_v1, %v2125_v50 }
 0x29a   : > { %2074 = vrot.lane.b32.xlu1 %v1818_v36, %s3190_s17  ;;  %2076 = vrot.lane.b32.xlu0 %v1819_v18, %s3190_s17  ;;  %v1804_v31 = vld [vmem:[#allocation2 + $0xd8] sm:$0xff]  ;;  %v1805_v63 = vld [vmem:[#allocation2 + $0xe0] sm:$0xff]  ;;  %s424_s17 = sadd.s32 %s2897_s26, %s2896_s24 }
 0x29b   : > { %3068 = vmatmul.mubr.msk.f32.gmra.mxu1 %vm2491_vm11, %v2471_v10  ;;  %v1820_v56 = vld [vmem:[#allocation2 + $0xd9] sm:$0xff]  ;;  %s2898_s28 = sshll.u32 %s424_s17, 3 }
 0x29c   : > { %v1935_v58 = vpop.permute.xlu1 %1934  ;;  %v4545_v19 = vpop.permute.xlu0 %1936  ;;  %v1836_v4 = vld [vmem:[#allocation2 + $0xda] sm:$0xff]  ;;  %s4694_s13 = scalar_lea.vmem %s4787_s8, %s2898_s28 }
 0x29d   : > { %v2374_v21 = vsel %vm1165_vm6, %v2358_v25, %v1935_v58  ;;  %v2375_v22 = vsel %vm1165_vm6, %v2359_v27, %v4545_v19 }
 0x29e   : > { %2326 = vrot.lane.b32.xlu1 %v1834_v20, %s3195_s27  ;;  %2328 = vrot.lane.b32.xlu0 %v1835_v23, %s3195_s27 }
 0x2a0   : > { %v2187_v29 = vpop.permute.xlu1 %2186  ;;  %v2189_v13 = vpop.permute.xlu0 %2188 }
 0x2a1   : > { %v2438_v8 = vsel %vm2431_vm3, %v2421_v61, %v2187_v29  ;;  %v2439_v15 = vsel %vm2431_vm3, %v2422_v48, %v2189_v13 }
 0x2a2   : > { %2138 = vrot.lane.b32.xlu1 %v1834_v20, %s3192_s20  ;;  %2202 = vrot.lane.b32.xlu0 %v1804_v31, %s3193_s21 }
 0x2a4   : > { %v1999_v33 = vpop.permute.xlu1 %1998  ;;  %v4551_v40 = vpop.permute.xlu0 %2000 }
 0x2a5   : > { %v2390_v3 = vsel %vm1207_vm8, %v2374_v21, %v1999_v33  ;;  %v2391_v58 = vsel %vm1207_vm8, %v2375_v22, %v4551_v40 }
 0x2a6   : > { %2140 = vrot.lane.b32.xlu1 %v1835_v23, %s3192_s20  ;;  %2266 = vrot.lane.b32.xlu0 %v1820_v56, %s3194_s14 }
 0x2a8   : > { %v2251_v16 = vpop.permute.xlu1 %2250  ;;  %v2253_v44 = vpop.permute.xlu0 %2252 }
 0x2a9   : > { %v2455_v0 = vsel %vm2448_vm7, %v2438_v8, %v2251_v16  ;;  %v2456_v5 = vsel %vm2448_vm7, %v2439_v15, %v2253_v44 }
 0x2aa   : > { %2204 = vrot.lane.b32.xlu1 %v1805_v63, %s3193_s21  ;;  %2330 = vrot.lane.b32.xlu0 %v1836_v4, %s3195_s27 }
 0x2ac   : > { %v2063_v6 = vpop.permute.xlu1 %2062  ;;  %v4564_v39 = vpop.permute.xlu0 %1874 }
 0x2ad   : > { %v2406_v10 = vsel %vm1249_vm10, %v2390_v3, %v2063_v6 }
 0x2ae   : > { %2268 = vrot.lane.b32.xlu1 %v1821_v52, %s3194_s14 }
 0x2b0   : > { %v2315_v55 = vpop.permute.xlu1 %2314  ;;  %v2127_v47 = vpop.permute.xlu0 %2126 }
 0x2b1   : > { %v2472_v62 = vsel %vm2465_vm9, %v2455_v0, %v2315_v55  ;;  %v2423_v20 = vsel %vm2414_vm5, %v2406_v10, %v2127_v47  ;;  %v2360_v0 = vsel %vm1123_vm4, %v4290_v14, %v4564_v39 }
 0x2b2   : > { %2332 = vrot.lane.b32.xlu1 %v1837_v60, %s3195_s27  ;;  %3070 = vmatprep.mubr.msk.f32.mxu1 %vm2491_vm11, %v2472_v62 }
 0x2b4   : > { %v2065_v51 = vpop.permute.xlu1 %2064  ;;  %v4582_v38 = vpop.permute.xlu0 %1876 }
 0x2b5   : > { %v2407_v44 = vsel %vm1249_vm10, %v2391_v58, %v2065_v51  ;;  %v2361_v14 = vsel %vm1123_vm4, %v4292_v24, %v4582_v38 }
 0x2b8   : > { %v2317_v42 = vpop.permute.xlu1 %2316  ;;  %v2129_v53 = vpop.permute.xlu0 %2128 }
 0x2b9   : > { %v2473_v2 = vsel %vm2465_vm9, %v2456_v5, %v2317_v42  ;;  %v2424_v63 = vsel %vm2414_vm5, %v2407_v44, %v2129_v53 }
 0x2ba   : > { %3071 = vmatmul.mubr.msk.f32.gmra.mxu1 %vm2491_vm11, %v2473_v2 }
 0x2bc   : > { %v1939_v26 = vpop.permute.xlu1 %1938  ;;  %v1941_v54 = vpop.permute.xlu0 %1940 }
 0x2bd   : > { %v2376_v55 = vsel %vm1165_vm6, %v2360_v0, %v1939_v26  ;;  %v2377_v39 = vsel %vm1165_vm6, %v2361_v14, %v1941_v54 }
 0x2c0   : > { %v2191_v46 = vpop.permute.xlu1 %2190  ;;  %v2193_v37 = vpop.permute.xlu0 %2192 }
 0x2c1   : > { %v2440_v23 = vsel %vm2431_vm3, %v2423_v20, %v2191_v46  ;;  %v2441_v4 = vsel %vm2431_vm3, %v2424_v63, %v2193_v37 }
 0x2c4   : > { %v2003_v35 = vpop.permute.xlu1 %2002  ;;  %v2005_v36 = vpop.permute.xlu0 %2004 }
 0x2c5   : > { %v2392_v47 = vsel %vm1207_vm8, %v2376_v55, %v2003_v35  ;;  %v2393_v5 = vsel %vm1207_vm8, %v2377_v39, %v2005_v36  ;;  %v4679_v55 = vld [vmem:[%s4786_s7] ss:$0 sm:$0xff] }
 0x2c8   : > { %v2255_v18 = vpop.permute.xlu1 %2254  ;;  %v2257_v59 = vpop.permute.xlu0 %2256 }
 0x2c9   : > { %v2457_v29 = vsel %vm2448_vm7, %v2440_v23, %v2255_v18  ;;  %v2458_v32 = vsel %vm2448_vm7, %v2441_v4, %v2257_v59 }
 0x2cc   : > { %v2067_v9 = vpop.permute.xlu1 %2066  ;;  %v4595_v50 = vpop.permute.xlu0 %1878 }
 0x2cd   : > { %v2408_v41 = vsel %vm1249_vm10, %v2392_v47, %v2067_v9  ;;  %v2362_v10 = vsel %vm1123_vm4, %v4341_v49, %v4595_v50 }
 0x2d0   : > { %v2319_v13 = vpop.permute.xlu1 %2318  ;;  %v2131_v31 = vpop.permute.xlu0 %2130 }
 0x2d1   : > { %v2474_v56 = vsel %vm2465_vm9, %v2457_v29, %v2319_v13  ;;  %v2425_v43 = vsel %vm2414_vm5, %v2408_v41, %v2131_v31 }
 0x2d2   : > { %3073 = vmatprep.mubr.msk.f32.mxu1 %vm2491_vm11, %v2474_v56 }
 0x2d4   : > { %v2069_v33 = vpop.permute.xlu1 %2068  ;;  %v1881_v16 = vpop.permute.xlu0 %1880 }
 0x2d5   : > { %v2409_v2 = vsel %vm1249_vm10, %v2393_v5, %v2069_v33  ;;  %v2363_v20 = vsel %vm1123_vm4, %v4343_v57, %v1881_v16 }
 0x2d8   : > { %v2321_v45 = vpop.permute.xlu1 %2320  ;;  %v2133_v11 = vpop.permute.xlu0 %2132 }
 0x2d9   : > { %v2475_v34 = vsel %vm2465_vm9, %v2458_v32, %v2321_v45  ;;  %v2426_v26 = vsel %vm2414_vm5, %v2409_v2, %v2133_v11 }
 0x2da   : > { %3074 = vmatmul.mubr.msk.f32.gmra.mxu1 %vm2491_vm11, %v2475_v34 }
 0x2dc   : > { %v1943_v19 = vpop.permute.xlu1 %1942  ;;  %v1945_v30 = vpop.permute.xlu0 %1944 }
 0x2dd   : > { %v2378_v23 = vsel %vm1165_vm6, %v2362_v10, %v1943_v19  ;;  %v2379_v29 = vsel %vm1165_vm6, %v2363_v20, %v1945_v30 }
 0x2e0   : > { %v2195_v6 = vpop.permute.xlu1 %2194  ;;  %v2197_v40 = vpop.permute.xlu0 %2196 }
 0x2e1   : > { %v2442_v28 = vsel %vm2431_vm3, %v2425_v43, %v2195_v6  ;;  %v2443_v46 = vsel %vm2431_vm3, %v2426_v26, %v2197_v40 }
 0x2e4   : > { %v2007_v12 = vpop.permute.xlu1 %2006  ;;  %v2009_v52 = vpop.permute.xlu0 %2008 }
 0x2e5   : > { %v2394_v13 = vsel %vm1207_vm8, %v2378_v23, %v2007_v12  ;;  %v2395_v31 = vsel %vm1207_vm8, %v2379_v29, %v2009_v52 }
 0x2e8   : > { %v2259_v61 = vpop.permute.xlu1 %2258  ;;  %v2261_v8 = vpop.permute.xlu0 %2260 }
 0x2e9   : > { %v2459_v51 = vsel %vm2448_vm7, %v2442_v28, %v2259_v61  ;;  %v2460_v37 = vsel %vm2448_vm7, %v2443_v46, %v2261_v8  ;;  %v4673_v8 = vld [vmem:[%s4785_s6] ss:$0 sm:$0xff] }
 0x2ec   : > { %v2071_v62 = vpop.permute.xlu1 %2070  ;;  %v1883_v60 = vpop.permute.xlu0 %1882 }
 0x2ed   : > { %v2410_v22 = vsel %vm1249_vm10, %v2394_v13, %v2071_v62  ;;  %v2364_v11 = vsel %vm1123_vm4, %v4418_v17, %v1883_v60 }
 0x2f0   : > { %v2323_v1 = vpop.permute.xlu1 %2322  ;;  %v2135_v48 = vpop.permute.xlu0 %2134 }
 0x2f1   : > { %v2476_v15 = vsel %vm2465_vm9, %v2459_v51, %v2323_v1  ;;  %v2427_v49 = vsel %vm2414_vm5, %v2410_v22, %v2135_v48 }
 0x2f2   : > { %3076 = vmatprep.mubr.msk.f32.mxu1 %vm2491_vm11, %v2476_v15 }
 0x2f4   : > { %v2073_v42 = vpop.permute.xlu1 %2072  ;;  %v4632_v53 = vpop.permute.xlu0 %1884 }
 0x2f5   : > { %v2411_v58 = vsel %vm1249_vm10, %v2395_v31, %v2073_v42  ;;  %v2365_v51 = vsel %vm1123_vm4, %v4420_v7, %v4632_v53 }
 0x2f8   : > { %v2325_v35 = vpop.permute.xlu1 %2324  ;;  %v2137_v18 = vpop.permute.xlu0 %2136 }
 0x2f9   : > { %v2477_v24 = vsel %vm2465_vm9, %v2460_v37, %v2325_v35  ;;  %v2428_v50 = vsel %vm2414_vm5, %v2411_v58, %v2137_v18 }
 0x2fa   : > { %3077 = vmatmul.mubr.msk.f32.gmra.mxu1 %vm2491_vm11, %v2477_v24 }
 0x2fc   : > { %v1947_v38 = vpop.permute.xlu1 %1946  ;;  %v1949_v54 = vpop.permute.xlu0 %1948 }
 0x2fd   : > { %v2380_v30 = vsel %vm1165_vm6, %v2364_v11, %v1947_v38  ;;  %v2381_v15 = vsel %vm1165_vm6, %v2365_v51, %v1949_v54 }
 0x300   : > { %v2199_v36 = vpop.permute.xlu1 %2198  ;;  %v2201_v59 = vpop.permute.xlu0 %2200 }
 0x301   : > { %v2444_v57 = vsel %vm2431_vm3, %v2427_v49, %v2199_v36  ;;  %v2445_v33 = vsel %vm2431_vm3, %v2428_v50, %v2201_v59 }
 0x304   : > { %v2011_v25 = vpop.permute.xlu1 %2010  ;;  %v2013_v21 = vpop.permute.xlu0 %2012 }
 0x305   : > { %v2396_v6 = vsel %vm1207_vm8, %v2380_v30, %v2011_v25  ;;  %v2397_v14 = vsel %vm1207_vm8, %v2381_v15, %v2013_v21 }
 0x308   : > { %v2263_v3 = vpop.permute.xlu1 %2262  ;;  %v2265_v9 = vpop.permute.xlu0 %2264 }
 0x309   : > { %v2461_v16 = vsel %vm2448_vm7, %v2444_v57, %v2263_v3  ;;  %v2462_v44 = vsel %vm2448_vm7, %v2445_v33, %v2265_v9 }
 0x30c   : > { %v2075_v56 = vpop.permute.xlu1 %2074  ;;  %v2077_v27 = vpop.permute.xlu0 %2076 }
 0x30d   : > { %v2412_v40 = vsel %vm1249_vm10, %v2396_v6, %v2075_v56  ;;  %v2413_v42 = vsel %vm1249_vm10, %v2397_v14, %v2077_v27 }
 0x310   : > { %v2327_v63 = vpop.permute.xlu1 %2326  ;;  %v2329_v4 = vpop.permute.xlu0 %2328 }
 0x311   : > { %v2478_v32 = vsel %vm2465_vm9, %v2461_v16, %v2327_v63  ;;  %v2479_v45 = vsel %vm2465_vm9, %v2462_v44, %v2329_v4 }
 0x312   : > { %3079 = vmatprep.mubr.msk.f32.mxu1 %vm2491_vm11, %v2478_v32 }
 0x313   : > { %3080 = vmatmul.mubr.msk.f32.gmra.mxu1 %vm2491_vm11, %v2479_v45 }
 0x314   : > { %v2139_v34 = vpop.permute.xlu1 %2138  ;;  %v2203_v19 = vpop.permute.xlu0 %2202 }
 0x315   : > { %v2429_v12 = vsel %vm2414_vm5, %v2412_v40, %v2139_v34 }
 0x316   : > { %v2446_v17 = vsel %vm2431_vm3, %v2429_v12, %v2203_v19 }
 0x318   : > { %v2141_v52 = vpop.permute.xlu1 %2140  ;;  %v2267_v61 = vpop.permute.xlu0 %2266 }
 0x319   : > { %v2463_v47 = vsel %vm2448_vm7, %v2446_v17, %v2267_v61  ;;  %v2430_v53 = vsel %vm2414_vm5, %v2413_v42, %v2141_v52 }
 0x31b   : > { %v3063_v0 = vpop.f32.mrf.mxu1 }
 0x31c   : > { %v2693_v62 = vmul.f32 %v3063_v0, %v4673_v8  ;;  %v2205_v60 = vpop.permute.xlu1 %2204  ;;  %v2331_v41 = vpop.permute.xlu0 %2330 }
 0x31d   : > { %v2606_v43 = vpop.f32.mrf.mxu1  ;;  %v2480_v28 = vsel %vm2465_vm9, %v2463_v47, %v2331_v41  ;;  %v2447_v26 = vsel %vm2431_vm3, %v2430_v53, %v2205_v60 }
 0x31e   : > { %v2716_v1 = vadd.f32 %v4679_v55, %v2693_v62  ;;  %v2692_v48 = vmul.f32 %v4673_v8, %v2606_v43  ;;  %3082 = vmatprep.mubr.msk.f32.mxu1 %vm2491_vm11, %v2480_v28 }
 0x320   : > { %v2732_v39 = vmax.f32 %v2716_v1, 0.0  ;;  %v2715_v7 = vadd.f32 %v4679_v55, %v2692_v48  ;;  %v2269_v5 = vpop.permute.xlu1 %2268 }
 0x321   : > { %v2464_v46 = vsel %vm2448_vm7, %v2447_v26, %v2269_v5 }
 0x322   : > { %2748 = vst.msk [vmem:[%s4694_s13 + $0x8] sm:$0xff] %vm1123_vm4, %v2732_v39  ;;  %v2731_v2 = vmax.f32 %v2715_v7, 0.0 }
 0x324   : > { %2747 = vst.msk [vmem:[%s4694_s13] sm:$0xff] %vm1123_vm4, %v2731_v2  ;;  %v2333_v37 = vpop.permute.xlu1 %2332 }
 0x325   : > { %v2481_v35 = vsel %vm2465_vm9, %v2464_v46, %v2333_v37 }
 0x326   : > { %3083 = vmatmul.mubr.msk.f32.gmra.mxu1 %vm2491_vm11, %v2481_v35 }
 0x33b   : > { %v3066_v18 = vpop.f32.mrf.mxu1 }
 0x33c   : > { %v2695_v24 = vmul.f32 %v3066_v18, %v4673_v8 }
 0x33d   : > { %v2616_v38 = vpop.f32.mrf.mxu1 }
 0x33e   : > { %v2718_v54 = vadd.f32 %v4679_v55, %v2695_v24  ;;  %v2694_v36 = vmul.f32 %v4673_v8, %v2616_v38 }
 0x340   : > { %v2734_v59 = vmax.f32 %v2718_v54, 0.0  ;;  %v2717_v25 = vadd.f32 %v4679_v55, %v2694_v36 }
 0x342   : > { %2750 = vst.msk [vmem:[%s4694_s13 + $0x18] sm:$0xff] %vm1123_vm4, %v2734_v59  ;;  %v2733_v21 = vmax.f32 %v2717_v25, 0.0 }
 0x344   : > { %2749 = vst.msk [vmem:[%s4694_s13 + $0x10] sm:$0xff] %vm1123_vm4, %v2733_v21 }
 0x35b   : > { %v3069_v3 = vpop.f32.mrf.mxu1 }
 0x35c   : > { %v2697_v9 = vmul.f32 %v3069_v3, %v4673_v8 }
 0x35d   : > { %v2626_v10 = vpop.f32.mrf.mxu1 }
 0x35e   : > { %v2720_v20 = vadd.f32 %v4679_v55, %v2697_v9  ;;  %v2696_v23 = vmul.f32 %v4673_v8, %v2626_v10 }
 0x360   : > { %v2736_v29 = vmax.f32 %v2720_v20, 0.0  ;;  %v2719_v13 = vadd.f32 %v4679_v55, %v2696_v23 }
 0x362   : > { %2752 = vst.msk [vmem:[%s4694_s13 + $0x28] sm:$0xff] %vm1123_vm4, %v2736_v29  ;;  %v2735_v31 = vmax.f32 %v2719_v13, 0.0 }
 0x364   : > { %2751 = vst.msk [vmem:[%s4694_s13 + $0x20] sm:$0xff] %vm1123_vm4, %v2735_v31 }
 0x37a   : > { %v3072_v56 = vpop.f32.mrf.mxu1 }
 0x37b   : > { %v2699_v27 = vmul.f32 %v3072_v56, %v4673_v8 }
 0x37c   : > { %v2636_v22 = vpop.f32.mrf.mxu1 }
 0x37d   : > { %v2722_v58 = vadd.f32 %v4679_v55, %v2699_v27  ;;  %v2698_v49 = vmul.f32 %v4673_v8, %v2636_v22 }
 0x37f   : > { %v2738_v50 = vmax.f32 %v2722_v58, 0.0  ;;  %v2721_v57 = vadd.f32 %v4679_v55, %v2698_v49 }
 0x381   : > { %2754 = vst.msk [vmem:[%s4694_s13 + $0x38] sm:$0xff] %vm1123_vm4, %v2738_v50  ;;  %v2737_v33 = vmax.f32 %v2721_v57, 0.0 }
 0x383   : > { %2753 = vst.msk [vmem:[%s4694_s13 + $0x30] sm:$0xff] %vm1123_vm4, %v2737_v33 }
 0x39a   : > { %v3075_v16 = vpop.f32.mrf.mxu1 }
 0x39b   : > { %v2701_v44 = vmul.f32 %v3075_v16, %v4673_v8 }
 0x39c   : > { %v2646_v63 = vpop.f32.mrf.mxu1 }
 0x39d   : > { %v2724_v4 = vadd.f32 %v4679_v55, %v2701_v44  ;;  %v2700_v32 = vmul.f32 %v4673_v8, %v2646_v63 }
 0x39f   : > { %v2740_v45 = vmax.f32 %v2724_v4, 0.0  ;;  %v2723_v11 = vadd.f32 %v4679_v55, %v2700_v32 }
 0x3a1   : > { %2756 = vst.msk [vmem:[%s4694_s13 + $0x48] sm:$0xff] %vm1123_vm4, %v2740_v45  ;;  %v2739_v34 = vmax.f32 %v2723_v11, 0.0 }
 0x3a3   : > { %2755 = vst.msk [vmem:[%s4694_s13 + $0x40] sm:$0xff] %vm1123_vm4, %v2739_v34 }
 0x3ba   : > { %v3078_v19 = vpop.f32.mrf.mxu1 }
 0x3bb   : > { %v2703_v30 = vmul.f32 %v3078_v19, %v4673_v8 }
 0x3bc   : > { %v2656_v6 = vpop.f32.mrf.mxu1 }
 0x3bd   : > { %v2726_v40 = vadd.f32 %v4679_v55, %v2703_v30  ;;  %v2702_v12 = vmul.f32 %v4673_v8, %v2656_v6 }
 0x3bf   : > { %v2742_v52 = vmax.f32 %v2726_v40, 0.0  ;;  %v2725_v61 = vadd.f32 %v4679_v55, %v2702_v12 }
 0x3c1   : > { %2758 = vst.msk [vmem:[%s4694_s13 + $0x58] sm:$0xff] %vm1123_vm4, %v2742_v52  ;;  %v2741_v17 = vmax.f32 %v2725_v61, 0.0 }
 0x3c3   : > { %2757 = vst.msk [vmem:[%s4694_s13 + $0x50] sm:$0xff] %vm1123_vm4, %v2741_v17 }
 0x3d3   : > { %v3081_v0 = vpop.f32.mrf.mxu1 }
 0x3d4   : > { %v2705_v47 = vmul.f32 %v3081_v0, %v4673_v8 }
 0x3d5   : > { %v2666_v62 = vpop.f32.mrf.mxu1 }
 0x3d6   : > { %v2728_v60 = vadd.f32 %v4679_v55, %v2705_v47  ;;  %v2704_v41 = vmul.f32 %v4673_v8, %v2666_v62 }
 0x3d8   : > { %v2744_v43 = vmax.f32 %v2728_v60, 0.0  ;;  %v2727_v28 = vadd.f32 %v4679_v55, %v2704_v41 }
 0x3da   : > { %2760 = vst.msk [vmem:[%s4694_s13 + $0x68] sm:$0xff] %vm1123_vm4, %v2744_v43  ;;  %v2743_v51 = vmax.f32 %v2727_v28, 0.0 }
 0x3dc   : > { %2759 = vst.msk [vmem:[%s4694_s13 + $0x60] sm:$0xff] %vm1123_vm4, %v2743_v51 }
 0x3e6   : > { %v3084_v1 = vpop.f32.mrf.mxu1 }
 0x3e7   : > { %v2707_v48 = vmul.f32 %v3084_v1, %v4673_v8 }
 0x3e8   : > { %v2676_v15 = vpop.f32.mrf.mxu1 }
 0x3e9   : > { %v2730_v14 = vadd.f32 %v4679_v55, %v2707_v48  ;;  %v2706_v39 = vmul.f32 %v4673_v8, %v2676_v15 }
 0x3eb   : > { %v2746_v7 = vmax.f32 %v2730_v14, 0.0  ;;  %v2729_v5 = vadd.f32 %v4679_v55, %v2706_v39 }
 0x3ed   : > { %2762 = vst.msk [vmem:[%s4694_s13 + $0x78] sm:$0xff] %vm1123_vm4, %v2746_v7  ;;  %v2745_v42 = vmax.f32 %v2729_v5, 0.0 }
 0x3ef   : > { %2761 = vst.msk [vmem:[%s4694_s13 + $0x70] sm:$0xff] %vm1123_vm4, %v2745_v42 }
 0x3f0 PF: > { %s18_s9 = sadd.s32 1, %s3181_s9   ;;  %s4790_s27 = smov %s3173_s29 }
 0x3f1   : > { %p15_p9 = scmp.ge.s32.totalorder %s18_s9, 6   ;;  %s4791_s28 = smov %s3177_s30 }
 0x3f2   : > { %s4792_s29 = smov %s4795_s10  ;;  %s4793_s30 = smov %s4799_s11 }
 0x3f3   :  { %17 = sbr.rel (!%p15_p9) target bundleno = 3 (0x3), region = 87 }

</bundles_post_ra>
